<compile_context>
chip_gen: v5e
topology: v5e:2x2
jax: 0.10.0
libtpu: 0.0.40
codegen_flags: <defaults>
</compile_context>

<pallas_src>
import functools

import jax
import jax.numpy as jnp
from jax.experimental import pallas as pl
from jax.experimental.pallas import tpu as pltpu


def _round_up(x, m):
    return ((x + m - 1) // m) * m


def sage_conv_kernel(adj_ref, feat_k_ref, feat_self_ref, w_self_ref, w_neigh_ref,
                     out_ref, acc_ref, *, deg_col):
    k = pl.program_id(1)

    @pl.when(k == 0)
    def _init():
        acc_ref[...] = jnp.zeros_like(acc_ref)
        # Self projection once per row tile; hides under the (memory-bound)
        # aggregation loop instead of lengthening the finalize step.
        out_ref[...] = jnp.dot(feat_self_ref[...], w_self_ref[...],
                               preferred_element_type=jnp.float32
                               ).astype(out_ref.dtype)

    # Partial aggregation for this K tile: bf16 x bf16 on the MXU, f32 acc.
    # adj is streamed narrow (int8/fp8/bf16) and upcast to bf16 on the VPU --
    # exact for 0/1 adjacency.  The ones-column at `deg_col` in the feature
    # matrix folds the row-degree into the same matmul.
    adj = adj_ref[...].astype(jnp.bfloat16)                       # (tm, tk)
    acc_ref[...] += jnp.dot(adj, feat_k_ref[...],
                            preferred_element_type=jnp.float32)   # (tm, FA)

    @pl.when(k == pl.num_programs(1) - 1)
    def _finalize():
        acc = acc_ref[...]                                        # (tm, FA) f32
        deg = acc[:, deg_col:deg_col + 1]                         # (tm, 1) row degree
        inv = 1.0 / (deg + 1.0)                                   # exact reciprocal
        neigh = (acc * inv).astype(jnp.bfloat16)                  # (tm, FA)
        # Rows >= F of w_neigh are zero-padded, so the degree column (and any
        # other padding lanes) of `neigh` contribute nothing here.
        out_ref[...] = (out_ref[...].astype(jnp.float32)
                        + jnp.dot(neigh, w_neigh_ref[...],
                                  preferred_element_type=jnp.float32)
                        ).astype(out_ref.dtype)


def sage_conv(features, adj, weight, *, tm=512, tk=1024, adj_dtype=jnp.int8):
    """GraphSAGE layer forward (dense 2-D adjacency, bias=False).

    features: (N, F) f32, adj: (N, N) f32, weight: (O, 2F) f32 (torch layout).

    tm: node-row tile (MXU M dim), multiple of 128 (default 512).
    tk: aggregation K tile over N, multiple of 128 (default 1024).
    adj_dtype: HBM stream dtype for the adjacency.  int8 (default) is exact for
       0/1 adjacency and gives a 1 byte/elem N^2 stream on every chip; use
       jnp.float8_e4m3fn on v7x, or jnp.bfloat16 / jnp.float32 for weighted
       graphs (in-kernel compute is always bf16 x bf16 with f32 accumulation).

    Note: features and weights are streamed as bf16 (f32 accumulation), so
    results differ from an all-f32 reference at ~bf16 rounding level.
    """
    N, F = features.shape
    O, twoF = weight.shape
    assert twoF == 2 * F
    assert adj.shape == (N, N)
    assert tm % 128 == 0 and tk % 128 == 0

    bf16 = jnp.bfloat16
    F_pad = _round_up(F, 128)
    # Aggregation feature width: guarantee a spare lane column for the degree
    # fold (only costs an extra 128-lane block when F is already a multiple of
    # 128).
    FA = F_pad if F < F_pad else F_pad + 128
    deg_col = F
    O_pad = _round_up(O, 128)

    # Independent row/column padding (no lcm blow-up of the N^2 stream).
    Nr_pad = _round_up(N, tm)
    Nc_pad = _round_up(N, tk)
    Nf_pad = max(Nr_pad, Nc_pad)          # feature rows serve both axes

    # Zero-padded, lane-dense operands.  Features carry a "ones" column at
    # deg_col so `adj @ feats` lands the row degree in the accumulator.
    feats_p = jnp.zeros((Nf_pad, FA), bf16)
    feats_p = feats_p.at[:N, :F].set(features.astype(bf16))
    feats_p = feats_p.at[:N, deg_col].set(jnp.ones((N,), bf16))

    adj_p = jnp.zeros((Nr_pad, Nc_pad), adj_dtype).at[:N, :N].set(adj.astype(adj_dtype))

    # Torch (O, 2F) weight, split into the two projection halves (bf16).
    w_self = jnp.zeros((FA, O_pad), bf16).at[:F, :O].set(weight[:, :F].T.astype(bf16))
    w_neigh = jnp.zeros((FA, O_pad), bf16).at[:F, :O].set(weight[:, F:].T.astype(bf16))

    grid = (Nr_pad // tm, Nc_pad // tk)

    # VMEM budget: inputs/outputs double-buffered by the pipeliner + scratch,
    # plus headroom.  Cap at 48 MiB on v7x (64 MiB physical), ~100 MiB otherwise.
    adj_itemsize = jnp.dtype(adj_dtype).itemsize
    out_itemsize = jnp.dtype(features.dtype).itemsize
    buffered = 2 * (tm * tk * adj_itemsize          # adj tile
                    + tk * FA * 2                   # feature K tile (bf16)
                    + tm * FA * 2                   # self-feature tile (bf16)
                    + 2 * FA * O_pad * 2            # w_self + w_neigh (bf16)
                    + tm * O_pad * out_itemsize)    # output tile
    scratch_bytes = tm * FA * 4                     # f32 accumulator
    try:
        kind = jax.devices()[0].device_kind.lower()
    except Exception:
        kind = ""
    vmem_cap = (48 << 20) if ("v7" in kind or "tpu7" in kind) else (100 << 20)
    vmem_limit = int(min(max(buffered + scratch_bytes + (8 << 20), 16 << 20), vmem_cap))

    # Cost estimate includes the per-row-tile feature K re-stream.
    steps_i = Nr_pad // tm
    cost = pl.CostEstimate(
        flops=2 * Nr_pad * Nc_pad * FA + 2 * Nr_pad * (2 * FA) * O_pad,
        transcendentals=Nr_pad,
        bytes_accessed=(Nr_pad * Nc_pad * adj_itemsize
                        + steps_i * Nc_pad * FA * 2
                        + Nr_pad * FA * 2
                        + 2 * FA * O_pad * 2
                        + Nr_pad * O_pad * out_itemsize),
    )

    kernel = functools.partial(sage_conv_kernel, deg_col=deg_col)

    out_p = pl.pallas_call(
        kernel,
        out_shape=jax.ShapeDtypeStruct((Nr_pad, O_pad), features.dtype),
        grid_spec=pltpu.PrefetchScalarGridSpec(
            num_scalar_prefetch=0,
            grid=grid,
            in_specs=[
                pl.BlockSpec((tm, tk), lambda i, k: (i, k)),        # adj tile
                pl.BlockSpec((tk, FA), lambda i, k: (k, 0)),        # features, K tile
                pl.BlockSpec((tm, FA), lambda i, k: (i, 0)),        # features, self tile
                # Weights are constant across the grid -> fetched once by the
                # pipeliner.  (For very large F/O, single-buffer them with
                # pipeline_mode=pl.Buffered(1) to save VMEM.)
                pl.BlockSpec((FA, O_pad), lambda i, k: (0, 0)),     # w_self
                pl.BlockSpec((FA, O_pad), lambda i, k: (0, 0)),     # w_neigh
            ],
            out_specs=pl.BlockSpec((tm, O_pad), lambda i, k: (i, 0)),
            scratch_shapes=[
                pltpu.VMEM((tm, FA), jnp.float32),   # aggregation accumulator
            ],
        ),
        compiler_params=pltpu.CompilerParams(
            dimension_semantics=("parallel", "arbitrary"),
            vmem_limit_bytes=vmem_limit,
        ),
        cost_estimate=cost,
    )(adj_p, feats_p, feats_p, w_self, w_neigh)

    return out_p[:N, :O]


def sage_conv_reference(features, adj, weight):
    neigh = (adj @ features) / (jnp.sum(adj, axis=1, keepdims=True) + 1.0)
    data = jnp.concatenate([features, neigh], axis=-1)
    return data @ weight.T


if __name__ == "__main__":
    # Small synthetic problem: 200 nodes (NOT a tile multiple -> exercises the
    # padding path), 16 in-features, 32 out-features.
    N, F_in, F_out = 200, 16, 32

    key = jax.random.PRNGKey(0)
    k_feat, k_adj, k_w = jax.random.split(key, 3)

    features = jax.random.normal(k_feat, (N, F_in), dtype=jnp.float32)
    # Dense 0/1 adjacency (int8 streaming is exact for this).
    adj = (jax.random.uniform(k_adj, (N, N)) < 0.1).astype(jnp.float32)
    # nn.init.normal_(proj.weight): standard normal, torch layout (O, 2F), bias=False.
    weight = jax.random.normal(k_w, (F_out, 2 * F_in), dtype=jnp.float32)

    # Small tiles so the toy problem still exercises a 2x2 (row x K) grid with
    # the accumulator init/accumulate/finalize path; real graphs should use the
    # defaults (tm=512, tk=1024).
    out = sage_conv(features, adj, weight, tm=128, tk=128)
    out = jax.block_until_ready(out)

    ref = sage_conv_reference(features, adj, weight)
    assert out.shape == (N, F_out)
    # Features/weights are streamed as bf16 (f32 accumulation, exact degree and
    # exact reciprocal) -> tolerance reflects bf16 input rounding only.
    max_err = float(jnp.max(jnp.abs(out - ref)))
    assert jnp.allclose(out, ref, atol=5e-2, rtol=5e-2), \
        f"mismatch vs reference (max abs err {max_err})"

    print("KERNEL_OK")
</pallas_src>

<mosaic_0001>
module attributes {stable_mosaic.version = 11 : i64} {
  func.func @sage_conv_kernel(%arg0: i32, %arg1: i32, %arg2: memref<128x128xi8, #tpu.memory_space<vmem>>, %arg3: memref<128x128xbf16, #tpu.memory_space<vmem>>, %arg4: memref<128x128xbf16, #tpu.memory_space<vmem>>, %arg5: memref<128x128xbf16, #tpu.memory_space<vmem>>, %arg6: memref<128x128xbf16, #tpu.memory_space<vmem>>, %arg7: memref<128x128xf32, #tpu.memory_space<vmem>>, %arg8: memref<128x128xf32, #tpu.memory_space<vmem>>) attributes {dimension_semantics = [#tpu.dimension_semantics<parallel>, #tpu.dimension_semantics<arbitrary>], iteration_bounds = array<i64: 2, 2>, scalar_prefetch = 0 : i64, scratch_operands = 1 : i64, tpu.core_type = #tpu.core_type<tc>, window_params = [{transform_indices = @transform_0, window_bounds = array<i64: 128, 128>}, {transform_indices = @transform_1, window_bounds = array<i64: 128, 128>}, {transform_indices = @transform_2, window_bounds = array<i64: 128, 128>}, {pipeline_mode = #tpu.pipeline_mode<synchronous>, transform_indices = @transform_3, window_bounds = array<i64: 128, 128>}, {pipeline_mode = #tpu.pipeline_mode<synchronous>, transform_indices = @transform_4, window_bounds = array<i64: 128, 128>}, {transform_indices = @transform_5, window_bounds = array<i64: 128, 128>}]} {
    %c0_i32 = arith.constant 0 : i32
    %0 = arith.cmpi eq, %arg1, %c0_i32 : i32
    %1 = arith.extui %0 : i1 to i32
    %c0_i32_0 = arith.constant 0 : i32
    %2 = arith.cmpi ne, %1, %c0_i32_0 : i32
    scf.if %2 {
      %cst_9 = arith.constant 0.000000e+00 : f32
      %13 = vector.broadcast %cst_9 : f32 to vector<128x128xf32>
      %c0_10 = arith.constant 0 : index
      %c0_11 = arith.constant 0 : index
      %14 = vector.load %arg8[%c0_10, %c0_11] : memref<128x128xf32, #tpu.memory_space<vmem>>, vector<128x128xf32>
      tpu.vector_store %arg8[%c0_10, %c0_11], %13 {strides = array<i32>} : memref<128x128xf32, #tpu.memory_space<vmem>>, vector<128x128xf32>,
      %c0_12 = arith.constant 0 : index
      %c0_13 = arith.constant 0 : index
      %15 = vector.load %arg4[%c0_12, %c0_13] : memref<128x128xbf16, #tpu.memory_space<vmem>>, vector<128x128xbf16>
      %c0_14 = arith.constant 0 : index
      %c0_15 = arith.constant 0 : index
      %16 = vector.load %arg5[%c0_14, %c0_15] : memref<128x128xbf16, #tpu.memory_space<vmem>>, vector<128x128xbf16>
      %cst_16 = arith.constant dense<0.000000e+00> : vector<128x128xf32>
      %17 = tpu.matmul %15, %16, %cst_16 {dimension_numbers = #tpu.dot_dimension_numbers<[1], [0], [0], [1], [0, 0, 1, 1], [], []>} : vector<128x128xbf16>, vector<128x128xbf16>, vector<128x128xf32> -> vector<128x128xf32>
      %c0_17 = arith.constant 0 : index
      %c0_18 = arith.constant 0 : index
      %18 = vector.load %arg7[%c0_17, %c0_18] : memref<128x128xf32, #tpu.memory_space<vmem>>, vector<128x128xf32>
      tpu.vector_store %arg7[%c0_17, %c0_18], %17 {strides = array<i32>} : memref<128x128xf32, #tpu.memory_space<vmem>>, vector<128x128xf32>,
    } else {
    }
    %c0 = arith.constant 0 : index
    %c0_1 = arith.constant 0 : index
    %3 = vector.load %arg2[%c0, %c0_1] : memref<128x128xi8, #tpu.memory_space<vmem>>, vector<128x128xi8>
    %4 = arith.sitofp %3 : vector<128x128xi8> to vector<128x128xbf16>
    %c0_2 = arith.constant 0 : index
    %c0_3 = arith.constant 0 : index
    %5 = vector.load %arg8[%c0_2, %c0_3] : memref<128x128xf32, #tpu.memory_space<vmem>>, vector<128x128xf32>
    %c0_4 = arith.constant 0 : index
    %c0_5 = arith.constant 0 : index
    %6 = vector.load %arg3[%c0_4, %c0_5] : memref<128x128xbf16, #tpu.memory_space<vmem>>, vector<128x128xbf16>
    %cst = arith.constant dense<0.000000e+00> : vector<128x128xf32>
    %7 = tpu.matmul %4, %6, %cst {dimension_numbers = #tpu.dot_dimension_numbers<[1], [0], [0], [1], [0, 0, 1, 1], [], []>} : vector<128x128xbf16>, vector<128x128xbf16>, vector<128x128xf32> -> vector<128x128xf32>
    %8 = arith.addf %5, %7 : vector<128x128xf32>
    %c0_6 = arith.constant 0 : index
    %c0_7 = arith.constant 0 : index
    %9 = vector.load %arg8[%c0_6, %c0_7] : memref<128x128xf32, #tpu.memory_space<vmem>>, vector<128x128xf32>
    tpu.vector_store %arg8[%c0_6, %c0_7], %8 {strides = array<i32>} : memref<128x128xf32, #tpu.memory_space<vmem>>, vector<128x128xf32>,
    %c1_i32 = arith.constant 1 : i32
    %10 = arith.cmpi eq, %arg1, %c1_i32 : i32
    %11 = arith.extui %10 : i1 to i32
    %c0_i32_8 = arith.constant 0 : i32
    %12 = arith.cmpi ne, %11, %c0_i32_8 : i32
    scf.if %12 {
      %c0_9 = arith.constant 0 : index
      %c0_10 = arith.constant 0 : index
      %13 = vector.load %arg8[%c0_9, %c0_10] : memref<128x128xf32, #tpu.memory_space<vmem>>, vector<128x128xf32>
      %14 = vector.extract_strided_slice %13 {offsets = [0, 16], sizes = [128, 1], strides = [1, 1]} : vector<128x128xf32> to vector<128x1xf32>
      %cst_11 = arith.constant 1.000000e+00 : f32
      %15 = vector.broadcast %cst_11 : f32 to vector<128x1xf32>
      %16 = arith.addf %14, %15 : vector<128x1xf32>
      %cst_12 = arith.constant 1.000000e+00 : f32
      %17 = vector.broadcast %cst_12 : f32 to vector<128x1xf32>
      %18 = arith.divf %17, %16 : vector<128x1xf32>
      %19 = vector.broadcast %18 : vector<128x1xf32> to vector<128x128xf32>
      %20 = arith.mulf %13, %19 : vector<128x128xf32>
      %21 = arith.truncf %20 : vector<128x128xf32> to vector<128x128xbf16>
      %c0_13 = arith.constant 0 : index
      %c0_14 = arith.constant 0 : index
      %22 = vector.load %arg7[%c0_13, %c0_14] : memref<128x128xf32, #tpu.memory_space<vmem>>, vector<128x128xf32>
      %c0_15 = arith.constant 0 : index
      %c0_16 = arith.constant 0 : index
      %23 = vector.load %arg6[%c0_15, %c0_16] : memref<128x128xbf16, #tpu.memory_space<vmem>>, vector<128x128xbf16>
      %cst_17 = arith.constant dense<0.000000e+00> : vector<128x128xf32>
      %24 = tpu.matmul %21, %23, %cst_17 {dimension_numbers = #tpu.dot_dimension_numbers<[1], [0], [0], [1], [0, 0, 1, 1], [], []>} : vector<128x128xbf16>, vector<128x128xbf16>, vector<128x128xf32> -> vector<128x128xf32>
      %25 = arith.addf %22, %24 : vector<128x128xf32>
      %c0_18 = arith.constant 0 : index
      %c0_19 = arith.constant 0 : index
      %26 = vector.load %arg7[%c0_18, %c0_19] : memref<128x128xf32, #tpu.memory_space<vmem>>, vector<128x128xf32>
      tpu.vector_store %arg7[%c0_18, %c0_19], %25 {strides = array<i32>} : memref<128x128xf32, #tpu.memory_space<vmem>>, vector<128x128xf32>,
    } else {
    }
    return
  }
  func.func @transform_0(%arg0: i32, %arg1: i32) -> (i32, i32) {
    %c0_i32 = arith.constant 0 : i32
    return %arg0, %arg1 : i32, i32
  }
  func.func @transform_1(%arg0: i32, %arg1: i32) -> (i32, i32) {
    %c0_i32 = arith.constant 0 : i32
    %c0_i32_0 = arith.constant 0 : i32
    return %arg1, %c0_i32 : i32, i32
  }
  func.func @transform_2(%arg0: i32, %arg1: i32) -> (i32, i32) {
    %c0_i32 = arith.constant 0 : i32
    %c0_i32_0 = arith.constant 0 : i32
    return %arg0, %c0_i32 : i32, i32
  }
  func.func @transform_3(%arg0: i32, %arg1: i32) -> (i32, i32) {
    %c0_i32 = arith.constant 0 : i32
    %c0_i32_0 = arith.constant 0 : i32
    %c0_i32_1 = arith.constant 0 : i32
    return %c0_i32, %c0_i32_0 : i32, i32
  }
  func.func @transform_4(%arg0: i32, %arg1: i32) -> (i32, i32) {
    %c0_i32 = arith.constant 0 : i32
    %c0_i32_0 = arith.constant 0 : i32
    %c0_i32_1 = arith.constant 0 : i32
    return %c0_i32, %c0_i32_0 : i32, i32
  }
  func.func @transform_5(%arg0: i32, %arg1: i32) -> (i32, i32) {
    %c0_i32 = arith.constant 0 : i32
    %c0_i32_0 = arith.constant 0 : i32
    return %arg0, %c0_i32 : i32, i32
  }
}

</mosaic_0001>

<bundles_post_ra>
// kernel: tpu_custom_call.1
= control target key start
LH: loop header
LB: loop body
LE: loop exit
PB: predicated region body
PF: predicated region fallthrough
CT: control target
= control target key end

     0   :  { %s3077_s0 = inlined_call_operand.hbm [shape: s8[256,256], index: 0, kind: input, shape index: {}]   ;;  %s3078_s1 = inlined_call_operand.hbm [shape: bf16[256,128], index: 1, kind: input, shape index: {}]   ;;  %s3079_s2 = inlined_call_operand.hbm [shape: bf16[256,128], index: 2, kind: input, shape index: {}]   ;;  %s3080_s3 = inlined_call_operand.hbm [shape: bf16[128,128], index: 3, kind: input, shape index: {}]   ;;  %s3081_s4 = inlined_call_operand.hbm [shape: bf16[128,128], index: 4, kind: input, shape index: {}]   ;;  %s3082_s5 = inlined_call_operand.hbm [shape: f32[256,128], index: 5, kind: output, shape index: {}]  }
   0x1   :  { %3092 = sst [smem:[#allocation26_spill]] %s3077_s0 }
   0x2   :  { %3093 = sst [smem:[#allocation27_spill]] %s3078_s1 }
   0x3   :  { %3094 = sst [smem:[#allocation28_spill]] %s3080_s3 }
   0x4   :  { %3095 = sst [smem:[#allocation29_spill]] %s3081_s4 }
   0x5   :  { %3096 = sst [smem:[#allocation30_spill]] %s3082_s5 }
   0x6   :  { %10 = vsyncpa [#allocation4], 0 }
   0x7   :  { %12 = vsyncpa [#allocation4 + $0x1], 0 }
   0x8   :  { %13 = vsyncpa [#allocation7], 0 }
   0x9   :  { %15 = vsyncpa [#allocation7 + $0x1], 0 }
   0xa   :  { %16 = vsyncpa [#allocation10], 0 }
   0xb   :  { %17 = vsyncpa [#allocation5], 0 }
   0xc   :  { %19 = vsyncpa [#allocation5 + $0x1], 0  ;;  %s2320_s18 = smov 0   ;;  %s2322_s19 = smov 0  }
   0xd   :  { %s2324_s20 = smov 0   ;;  %s2326_s21 = smov 0  }
   0xe   :  { %s2328_s22 = smov 0   ;;  %s2330_s23 = smov 0  }
   0xf   :  { %s2332_s24 = smov 0   ;;  %s2334_s25 = smov 0  }
  0x10   :  { %s2336_s26 = smov 0   ;;  %s2338_s27 = smov 0  }
  0x11   :  { %s2340_s28 = smov 0   ;;  %s2342_s29 = smov 0  }
  0x12   :  { %s2344_s30 = smov 0   ;;  %s2346_s6 = smov 0  }
  0x13 LB: > { %3097 = sst [smem:[#allocation18_spill]] %s2241_s22  ;;  %s2391_s7 = sadd.s32 4294967295, %s2277_s6   ;;  %s2277_s6 = sphi %s2346_s6, %s25_s6   ;;  %s2273_s30 = sphi %s2344_s30, %s3195_s30   ;;  %s2269_s29 = sphi %s2342_s29, %s3194_s29   ;;  %s2265_s28 = sphi %s2340_s28, %s3193_s28   ;;  %s2261_s27 = sphi %s2338_s27, %s3192_s27   ;;  %s2257_s26 = sphi %s2336_s26, %s3191_s26   ;;  %s2253_s25 = sphi %s2334_s25, %s3190_s25   ;;  %s2249_s24 = sphi %s2332_s24, %s3189_s24   ;;  %s2245_s23 = sphi %s2330_s23, %s3188_s23   ;;  %s2241_s22 = sphi %s2328_s22, %s3187_s22   ;;  %s2237_s21 = sphi %s2326_s21, %s3178_s21   ;;  %s2233_s20 = sphi %s2324_s20, %s3186_s20   ;;  %s2229_s19 = sphi %s2322_s19, %s3185_s19   ;;  %s2225_s18 = sphi %s2320_s18, %s3184_s18  }
  0x14   : > { %3098 = sst [smem:[#allocation19_spill]] %s2261_s27  ;;  %p1504_p0 = scmp.ge.s32.totalorder %s2277_s6, 1 }
  0x15   : > { %3099 = sst [smem:[#allocation20_spill]] %s2265_s28  ;;  %p60_p1 = scmp.eq.s32.totalorder %s2391_s7, 0 }
  0x16   : > { %3100 = sst [smem:[#allocation21_spill]] %s2269_s29  ;;  %p177_p2 = scmp.eq.s32.totalorder %s2391_s7, 3 }
  0x17   : > { %p190_p3 = scmp.lt.s32.totalorder %s2277_s6, 5  ;;  %s3101_s3 = sld [smem:[#allocation28_spill]] }
  0x18   : > { %s2279_s12 = smov [#allocation9]   ;;  %s3083_s15 = smov 64  }
  0x19   : > { %p2400_p4 = pnand %p1504_p0, %p190_p3  ;;  %s203_s13 = sshll.u32 %s2279_s12, 4  ;;  %s204_s13 = int_to_ptr.vmem [resolvable:$true] %s203_s13 }
  0x1a   : > { %s3085_s16 = smov 4   ;;  %s34_s17 = sadd.s32 1, %s2269_s29 }
  0x1b   : > { %p1784_p5 = pneg %p2400_p4  ;;  %s37_s8 = sadd.s32 1, %s2273_s30 }
  0x1c   : > { %p35_p7 = scmp.ge.s32.totalorder %s34_s17, 2  ;;  %p54_p8 = scmp.eq.s32.totalorder %s2277_s6, 0 }
  0x1d   : > { %s201_s10 = sshll.u32 %s3101_s3, 4  ;;  %p2408_p6 = pnand %p1784_p5, %p60_p1  ;;  %s202_s10 = int_to_ptr.hbm [resolvable:$true] %s201_s10 }
  0x1e   : > { %s72_s9 = sadd.s32 1, %s2245_s23  ;;  %p79_p9 = scmp.ne.s32.totalorder %s2245_s23, %s2241_s22 }
  0x1f   : > { %1787 = dma.hbm_to_vmem [thread:$0]  (!%p2408_p6), %s202_s10, 1024, %s204_s13, [#allocation10], %s3083_s15, %s3083_s15, %s3085_s16  }
  0x20   : > { %s3197_s17 = smov (%p35_p7, %s34_s17), 0  ;;  %s3199_s8 = smov (!%p35_p7, %s37_s8), %s2273_s30 }
  0x21   : > { %3104 = sst [smem:[#allocation22_spill]] %s3197_s17  ;;  %s42_s12 = ssub.s32 %s2269_s29, %s3197_s17 }
  0x22   : > { %p2430_p10 = por %p79_p9, %p54_p8  ;;  %p39_p11 = scmp.ge.s32.totalorder %s3199_s8, 2 }
  0x23   : > { %p70_p12 = scmp.eq.s32.totalorder %s42_s12, 0  ;;  %p85_p13 = scmp.ne.s32.totalorder %s2241_s22, %s2237_s21 }
  0x24   : > { %p1807_p0 = scmp.lt.s32.totalorder %s2277_s6, 4  ;;  %s3201_s8 = smov (%p39_p11, %s3199_s8), 0 }
  0x25   : > { %3106 = sst [smem:[#allocation23_spill]] %s3201_s8  ;;  %s2444_s15 = ssub.s32 %s2273_s30, %s3201_s8 }
  0x26   : > { %s2440_s13 = scalar_select %p70_p12, %s2245_s23, %s72_s9  }
  0x27   : > { %p2448_p3 = por %p85_p13, %p60_p1  ;;  %s43_s3 = sor.u32 %s42_s12, %s2444_s15 }
  0x28   : > { %3107 = sst [smem:[#allocation24_spill]] %s2440_s13  ;;  %p96_p5 = scmp.eq.s32.totalorder %s2444_s15, 0 }
  0x29   : > { %p2454_p7 = scmp.eq.s32.totalorder %s43_s3, 0  ;;  %s255_s17 = sand.u32 1, %s2277_s6  }
  0x2a   : > { %s257_s9 = sand.u32 1, %s2245_s23   ;;  %s1661_s5 = sshll.u32 %s2269_s29, 6 }
  0x2b   : > { %s1512_s13 = sshll.u32 %s257_s9, 6  ;;  %s3110_s1 = sld [smem:[#allocation27_spill]] }
  0x2c   : > { %s259_s12 = scalar_lea.vmem [#allocation6], %s1512_s13  ;;  %p1795_p9 = pnand %p1807_p0, %p2430_p10 }
  0x2d   : > { %s267_s3 = sshll.u32 %s259_s12, 4  ;;  %s3111_s4 = sld [smem:[#allocation29_spill]]  ;;  %s268_s3 = int_to_ptr.vmem [resolvable:$true] %s267_s3 }
  0x2e   : > { %s2471_s9 = scalar_lea.sflag [#allocation7], %s255_s17  ;;  %s3112_s12 = smov 4  }
  0x2f   : > { %s46_s10 = sadd.s32 1, %s2257_s26  ;;  %p53_p10 = scmp.ne.s32.totalorder %s2257_s26, %s2253_s25 }
  0x30   : > { %s2486_s28 = scalar_select %p2454_p7, %s2257_s26, %s46_s10  }
  0x31   : > { %s264_s27 = scalar_lea.hbm %s3110_s1, %s1661_s5  ;;  %s3113_s1 = smov 64  }
  0x32   : > { %s265_s22 = sshll.u32 %s264_s27, 4  ;;  %s2282_s27 = smov [#allocation11]   ;;  %s266_s22 = int_to_ptr.hbm [resolvable:$true] %s265_s22 }
  0x33   : > { %s215_s5 = sshll.u32 %s3111_s4, 4  ;;  %s217_s13 = sshll.u32 %s2282_s27, 4  ;;  %s216_s5 = int_to_ptr.hbm [resolvable:$true] %s215_s5  ;;  %s218_s13 = int_to_ptr.vmem [resolvable:$true] %s217_s13 }
  0x34   : > { %1797 = dma.hbm_to_vmem [thread:$0]  (!%p1795_p9), %s266_s22, 1024, %s268_s3, %s2471_s9, %s3113_s1, %s3113_s1, %s3112_s12  }
  0x35   : > { %1790 = dma.hbm_to_vmem [thread:$0]  (!%p2408_p6), %s216_s5, 1024, %s218_s13, [#allocation10], %s3113_s1, %s3113_s1, %s3112_s12  }
  0x36   : > { %3114 = sst [smem:[#allocation25_spill]] %s2486_s28  ;;  %p59_p11 = scmp.ne.s32.totalorder %s2253_s25, %s2249_s24 }
  0x37   : > { %s231_s17 = sand.u32 1, %s2257_s26   ;;  %s1660_s8 = sshll.u32 %s2273_s30, 3 }
  0x38   : > { %p55_p12 = por %p54_p8, %p53_p10  ;;  %p2498_p13 = por %p60_p1, %p59_p11 }
  0x39   : > { %s1508_s14 = sshll.u32 %s231_s17, 5  ;;  %s240_s3 = sadd.s32 %s2269_s29, %s1660_s8 }
  0x3a   : > { %s1511_s21 = sshll.u32 %s240_s3, 3  ;;  %s235_s5 = scalar_lea.vmem [#allocation3], %s1508_s14 }
  0x3b   : > { %s245_s24 = sshll.u32 %s235_s5, 4  ;;  %s3116_s0 = sld [smem:[#allocation26_spill]]  ;;  %s246_s24 = int_to_ptr.vmem [resolvable:$true] %s245_s24 }
  0x3c   : > { %p1792_p6 = pnand %p1807_p0, %p55_p12  ;;  %s232_s8 = scalar_lea.sflag [#allocation4], %s231_s17 }
  0x3d   : > { %s2283_s3 = smov 256   ;;  %s2284_s14 = smov 128  }
  0x3e   : > { %s2285_s29 = smov 8   ;;  %s1503_s5 = sadd.s32 4294967294, %s2277_s6  }
  0x3f   : > { %s98_s28 = sadd.s32 1, %s2233_s20  ;;  %p105_p7 = scmp.ne.s32.totalorder %s2233_s20, %s2229_s19 }
  0x40   : > { %s2515_s27 = scalar_select %p96_p5, %s2233_s20, %s98_s28  }
  0x41   : > { %s242_s10 = scalar_lea.hbm %s3116_s0, %s1511_s21  ;;  %p2519_p9 = por %p105_p7, %p54_p8 }
  0x42   : > { %s243_s4 = sshll.u32 %s242_s10, 4  ;;  %p111_p10 = scmp.ne.s32.totalorder %s2229_s19, %s2225_s18  ;;  %s244_s4 = int_to_ptr.hbm [resolvable:$true] %s243_s4 }
  0x43   : > { %1794 = dma.hbm_to_vmem [thread:$0]  (!%p1792_p6), %s244_s4, 512, %s246_s24, %s232_s8, %s2283_s3, %s2284_s14, %s2285_s29  }
  0x44   : > { %p2527_p11 = por %p177_p2, %p105_p7  ;;  %p183_p12 = scmp.eq.s32.totalorder %s1503_s5, 3 }
  0x45   : > { %p2533_p6 = por %p111_p10, %p60_p1  ;;  %s279_s29 = sand.u32 1, %s2233_s20  }
  0x46   : > { %p2538_p5 = por %p183_p12, %p111_p10  ;;  %s1515_s28 = sshll.u32 %s279_s29, 6 }
  0x47   : > { %s1662_s24 = sshll.u32 %s2273_s30, 6  ;;  %s281_s3 = scalar_lea.vmem [#allocation8], %s1515_s28 }
  0x48   : > { %s286_s8 = scalar_lea.hbm %s3079_s2, %s1662_s24  ;;  %s289_s14 = sshll.u32 %s281_s3, 4  ;;  %s290_s14 = int_to_ptr.vmem [resolvable:$true] %s289_s14 }
  0x49   : > { %s287_s0 = sshll.u32 %s286_s8, 4  ;;  %p1798_p2 = pnand %p1807_p0, %p2519_p9  ;;  %s288_s0 = int_to_ptr.hbm [resolvable:$true] %s287_s0 }
  0x4a   : > { %301 = sbr.rel (%p2400_p4) target bundleno = 838 (0x346), region = 40  ;;  %s303_s5 = sand.u32 (!%p2400_p4), 1, %s2253_s25  }
  0x4b   : > { %1800 = dma.hbm_to_vmem [thread:$0]  (!%p1798_p2), %s288_s0, 1024, %s290_s14, %s2471_s9, %s3113_s1, %s3113_s1, %s3112_s12  }
  0x4c   : > { %s1519_s29 = sshll.u32 (!%p2400_p4), %s303_s5, 5  ;;  %s304_s24 = scalar_lea.sflag (!%p2400_p4), [#allocation4], %s303_s5 }
  0x4d   : > { %s2557_s28 = scalar_lea.vmem (!%p2400_p4), [#allocation3], %s1519_s29 }
  0x4f   : > { %2204 = dma.done.wait (%p2498_p13), %s304_s24, 512  }
  0x50   : > { %2206 = vsyncadd (%p2498_p13), %s304_s24, 4294966784  ;;  %s3121_s21 = sld [smem:[#allocation18_spill]]  ;;  %s313_s13 = sand.u32 1, %s2391_s7  }
  0x51   : > { %s314_s11 = scalar_lea.sflag [#allocation7], %s313_s13 }
  0x56   : > { %s315_s0 = sand.u32 1, %s3121_s21  }
  0x57   : > { %s1520_s1 = sshll.u32 %s315_s0, 6 }
  0x58   : > { %s2565_s9 = scalar_lea.vmem [#allocation6], %s1520_s1 }
  0x59   : > { %2208 = dma.done.wait (%p2448_p3), %s314_s11, 1024  }
  0x5a   : > { %2210 = vsyncadd (%p2448_p3), %s314_s11, 4294966272  ;;  %s2572_s12 = sand.u32 1, %s2229_s19  }
  0x5b   : > { %s1521_s22 = sshll.u32 %s2572_s12, 6 }
  0x5c   : > { %s2575_s10 = scalar_lea.vmem [#allocation8], %s1521_s22 }
  0x5d   : > { %2212 = dma.done.wait (%p2533_p6), %s314_s11, 1024  }
  0x5e   : > { %2214 = vsyncadd (%p2533_p6), %s314_s11, 4294966272 }
  0x5f   : > { %2216 = dma.done.wait (%p60_p1), [#allocation10], 2048  }
  0x60   : > { %2218 = vsyncadd (%p60_p1), [#allocation10], 4294965248  ;;  %s1524_s16 = sshll.u32 %s2572_s12, 7  ;;  %s3122_s3 = sld [smem:[#allocation19_spill]] }
  0x61   : > { %s2586_s8 = scalar_lea.vmem [#allocation12], %s1524_s16 }
  0x66   : > { %p1525_p4 = scmp.ne.s32.totalorder %s3122_s3, 0 }
  0x68   : > { %382 = sbr.rel (%p1525_p4) target bundleno = 300 (0x12c), region = 64 }
  0x6d   : > { %v1678_v0 = vld [vmem:[#allocation9 + $0x38] sm:$0xff]  ;;  %v2286_v1 = vmov 0.0   ;;  %v1677_v2 = vld [vmem:[#allocation9 + $0x30] sm:$0xff]  ;;  %v1676_v3 = vld [vmem:[#allocation9 + $0x28] sm:$0xff] }
  0x6e   : > { %383 = vst [vmem:[#allocation2 + $0x30] sm:$0xff] %v2286_v1  ;;  %527 = vmatpush.bf16.msra.mxu0 %v1678_v0  ;;  %1696 = vmatpush.bf16.msra.mxu1 %v1678_v0  ;;  %v1675_v4 = vld [vmem:[#allocation9 + $0x20] sm:$0xff]  ;;  %v1674_v5 = vld [vmem:[#allocation9 + $0x18] sm:$0xff]  ;;  %v1673_v6 = vld [vmem:[#allocation9 + $0x10] sm:$0xff] }
  0x6f   : > { %384 = vst [vmem:[#allocation2] sm:$0xff] %v2286_v1  ;;  %1697 = vmatpush.bf16.msra.mxu2 %v1678_v0  ;;  %1698 = vmatpush.bf16.msra.mxu3 %v1678_v0  ;;  %v1672_v7 = vld [vmem:[#allocation9 + $0x8] sm:$0xff]  ;;  %v1671_v8 = vld [vmem:[#allocation9] sm:$0xff]  ;;  %v1665_v10 = vld [vmem:[%s2575_s10 + $0x10] sm:$0xff] }
  0x70   : > { %385 = vst [vmem:[#allocation2 + $0x58] sm:$0xff] %v2286_v1  ;;  %v1663_v9 = vld [vmem:[%s2575_s10] sm:$0xff]  ;;  %v1669_v12 = vld [vmem:[%s2575_s10 + $0x30] sm:$0xff]  ;;  %v1664_v13 = vld [vmem:[%s2575_s10 + $0x8] sm:$0xff] }
  0x71   : > { %386 = vst [vmem:[#allocation2 + $0x18] sm:$0xff] %v2286_v1  ;;  %v1667_v11 = vld [vmem:[%s2575_s10 + $0x20] sm:$0xff]  ;;  %v1666_v14 = vld [vmem:[%s2575_s10 + $0x18] sm:$0xff]  ;;  %v1668_v15 = vld [vmem:[%s2575_s10 + $0x28] sm:$0xff] }
  0x72   : > { %387 = vst [vmem:[#allocation2 + $0x50] sm:$0xff] %v2286_v1  ;;  %528 = vmatpush.bf16.msra.mxu0 %v1677_v2  ;;  %1699 = vmatpush.bf16.msra.mxu1 %v1677_v2  ;;  %v1670_v16 = vld [vmem:[%s2575_s10 + $0x38] sm:$0xff] }
  0x73   : > { %388 = vst [vmem:[#allocation2 + $0x68] sm:$0xff] %v2286_v1  ;;  %1700 = vmatpush.bf16.msra.mxu2 %v1677_v2  ;;  %1701 = vmatpush.bf16.msra.mxu3 %v1677_v2 }
  0x74   : > { %389 = vst [vmem:[#allocation2 + $0x8] sm:$0xff] %v2286_v1 }
  0x75   : > { %390 = vst [vmem:[#allocation2 + $0x48] sm:$0xff] %v2286_v1 }
  0x76   : > { %391 = vst [vmem:[#allocation2 + $0x40] sm:$0xff] %v2286_v1  ;;  %529 = vmatpush.bf16.msra.mxu0 %v1676_v3  ;;  %1702 = vmatpush.bf16.msra.mxu1 %v1676_v3 }
  0x77   : > { %392 = vst [vmem:[#allocation2 + $0x20] sm:$0xff] %v2286_v1  ;;  %1703 = vmatpush.bf16.msra.mxu2 %v1676_v3  ;;  %1704 = vmatpush.bf16.msra.mxu3 %v1676_v3 }
  0x78   : > { %393 = vst [vmem:[#allocation2 + $0x10] sm:$0xff] %v2286_v1 }
  0x79   : > { %394 = vst [vmem:[#allocation2 + $0x38] sm:$0xff] %v2286_v1 }
  0x7a   : > { %395 = vst [vmem:[#allocation2 + $0x60] sm:$0xff] %v2286_v1  ;;  %530 = vmatpush.bf16.msra.mxu0 %v1675_v4  ;;  %1705 = vmatpush.bf16.msra.mxu1 %v1675_v4 }
  0x7b   : > { %396 = vst [vmem:[#allocation2 + $0x70] sm:$0xff] %v2286_v1  ;;  %1706 = vmatpush.bf16.msra.mxu2 %v1675_v4  ;;  %1707 = vmatpush.bf16.msra.mxu3 %v1675_v4 }
  0x7c   : > { %397 = vst [vmem:[#allocation2 + $0x78] sm:$0xff] %v2286_v1 }
  0x7d   : > { %398 = vst [vmem:[#allocation2 + $0x28] sm:$0xff] %v2286_v1 }
  0x7e   : > { %531 = vmatpush.bf16.msra.mxu0 %v1674_v5  ;;  %1708 = vmatpush.bf16.msra.mxu1 %v1674_v5 }
  0x7f   : > { %1709 = vmatpush.bf16.msra.mxu2 %v1674_v5  ;;  %1710 = vmatpush.bf16.msra.mxu3 %v1674_v5 }
  0x82   : > { %532 = vmatpush.bf16.msra.mxu0 %v1673_v6  ;;  %1711 = vmatpush.bf16.msra.mxu1 %v1673_v6 }
  0x83   : > { %1712 = vmatpush.bf16.msra.mxu2 %v1673_v6  ;;  %1713 = vmatpush.bf16.msra.mxu3 %v1673_v6 }
  0x86   : > { %533 = vmatpush.bf16.msra.mxu0 %v1672_v7  ;;  %1714 = vmatpush.bf16.msra.mxu1 %v1672_v7 }
  0x87   : > { %1715 = vmatpush.bf16.msra.mxu2 %v1672_v7  ;;  %1716 = vmatpush.bf16.msra.mxu3 %v1672_v7 }
  0x8a   : > { %534 = vmatpush.bf16.msra.mxu0 %v1671_v8  ;;  %1717 = vmatpush.bf16.msra.mxu1 %v1671_v8 }
  0x8b   : > { %1718 = vmatpush.bf16.msra.mxu2 %v1671_v8  ;;  %1719 = vmatpush.bf16.msra.mxu3 %v1671_v8 }
  0x8d   : > { %535 = vmatmul.bf16.vlgmr.msra.gmra.mxu0 %v1663_v9  ;;  %545 = vmatmul.bf16.vlgmr.msra.gmra.mxu1 %v1665_v10 }
  0x8e   : > { %555 = vmatmul.bf16.vlgmr.msra.gmra.mxu2 %v1667_v11  ;;  %565 = vmatmul.bf16.vlgmr.msra.gmra.mxu3 %v1669_v12 }
  0x9d   : > { %540 = vmatmul.bf16.gmra.mxu0 %v1664_v13  ;;  %550 = vmatmul.bf16.gmra.mxu1 %v1666_v14 }
  0x9e   : > { %560 = vmatmul.bf16.gmra.mxu2 %v1668_v15  ;;  %570 = vmatmul.bf16.gmra.mxu3 %v1670_v16 }
 0x10a   : > { %v536_v17 = vpop.f32.mrf.mxu0  ;;  %v546_v18 = vpop.f32.mrf.mxu1 }
 0x10b   : > { %576 = vst [vmem:[%s2586_s8] sm:$0xff] %v536_v17 }
 0x10c   : > { %580 = vst [vmem:[%s2586_s8 + $0x20] sm:$0xff] %v546_v18 }
 0x111   : > { %v556_v19 = vpop.f32.mrf.mxu2  ;;  %v566_v20 = vpop.f32.mrf.mxu3 }
 0x112   : > { %584 = vst [vmem:[%s2586_s8 + $0x40] sm:$0xff] %v556_v19  ;;  %v538_v21 = vpop.f32.mrf.mxu0  ;;  %v548_v22 = vpop.f32.mrf.mxu1 }
 0x113   : > { %588 = vst [vmem:[%s2586_s8 + $0x60] sm:$0xff] %v566_v20 }
 0x114   : > { %577 = vst [vmem:[%s2586_s8 + $0x8] sm:$0xff] %v538_v21 }
 0x115   : > { %581 = vst [vmem:[%s2586_s8 + $0x28] sm:$0xff] %v548_v22 }
 0x119   : > { %v558_v23 = vpop.f32.mrf.mxu2  ;;  %v568_v24 = vpop.f32.mrf.mxu3 }
 0x11a   : > { %585 = vst [vmem:[%s2586_s8 + $0x48] sm:$0xff] %v558_v23  ;;  %v541_v25 = vpop.f32.mrf.mxu0  ;;  %v551_v26 = vpop.f32.mrf.mxu1 }
 0x11b   : > { %589 = vst [vmem:[%s2586_s8 + $0x68] sm:$0xff] %v568_v24 }
 0x11c   : > { %578 = vst [vmem:[%s2586_s8 + $0x10] sm:$0xff] %v541_v25 }
 0x11d   : > { %582 = vst [vmem:[%s2586_s8 + $0x30] sm:$0xff] %v551_v26 }
 0x121   : > { %v561_v27 = vpop.f32.mrf.mxu2  ;;  %v571_v28 = vpop.f32.mrf.mxu3 }
 0x122   : > { %586 = vst [vmem:[%s2586_s8 + $0x50] sm:$0xff] %v561_v27  ;;  %v543_v29 = vpop.f32.mrf.mxu0  ;;  %v553_v30 = vpop.f32.mrf.mxu1 }
 0x123   : > { %590 = vst [vmem:[%s2586_s8 + $0x70] sm:$0xff] %v571_v28 }
 0x124   : > { %579 = vst [vmem:[%s2586_s8 + $0x18] sm:$0xff] %v543_v29 }
 0x125   : > { %583 = vst [vmem:[%s2586_s8 + $0x38] sm:$0xff] %v553_v30 }
 0x129   : > { %v563_v31 = vpop.f32.mrf.mxu2  ;;  %v573_v32 = vpop.f32.mrf.mxu3 }
 0x12a   : > { %587 = vst [vmem:[%s2586_s8 + $0x58] sm:$0xff] %v563_v31 }
 0x12b   : > { %591 = vst [vmem:[%s2586_s8 + $0x78] sm:$0xff] %v573_v32 }
 0x12c PF: > { %v1686_v33 = vld [vmem:[%s2565_s9 + $0x38] sm:$0xff]  ;;  %v1685_v34 = vld [vmem:[%s2565_s9 + $0x30] sm:$0xff]  ;;  %v1684_v35 = vld [vmem:[%s2565_s9 + $0x28] sm:$0xff]  ;;  %s3123_s7 = sld [smem:[#allocation19_spill]] }
 0x12d   : > { %716 = vmatpush.bf16.msra.mxu0 %v1686_v33  ;;  %1720 = vmatpush.bf16.msra.mxu1 %v1686_v33  ;;  %v1683_v36 = vld [vmem:[%s2565_s9 + $0x20] sm:$0xff]  ;;  %v1682_v37 = vld [vmem:[%s2565_s9 + $0x18] sm:$0xff]  ;;  %v1681_v38 = vld [vmem:[%s2565_s9 + $0x10] sm:$0xff] }
 0x12e   : > { %1721 = vmatpush.bf16.msra.mxu2 %v1686_v33  ;;  %1722 = vmatpush.bf16.msra.mxu3 %v1686_v33  ;;  %v592_v39 = vld [vmem:[%s2557_s28] sm:$0xff]  ;;  %v593_v40 = vld [vmem:[%s2557_s28 + $0x8] sm:$0xff]  ;;  %v594_v41 = vld [vmem:[%s2557_s28 + $0x10] sm:$0xff] }
 0x12f   : > { %v595_v42 = vld [vmem:[%s2557_s28 + $0x18] sm:$0xff]  ;;  %v596_v43 = vunpack.c.0.s8 %v592_v39  ;;  %v597_v44 = vunpack.c.1.s8 %v592_v39  ;;  %v600_v45 = vunpack.c.0.s8 %v593_v40  ;;  %v601_v46 = vunpack.c.1.s8 %v593_v40  ;;  %v1680_v47 = vld [vmem:[%s2565_s9 + $0x8] sm:$0xff]  ;;  %v1679_v56 = vld [vmem:[%s2565_s9] sm:$0xff] }
 0x130   : > { %v604_v48 = vunpack.c.0.s8 %v594_v41  ;;  %v605_v49 = vunpack.c.1.s8 %v594_v41  ;;  %v608_v50 = vunpack.c.0.s8 %v595_v42  ;;  %v609_v51 = vunpack.c.1.s8 %v595_v42  ;;  %v636_v21 = vld [vmem:[#allocation2 + $0x30] sm:$0xff]  ;;  %v644_v27 = vld [vmem:[#allocation2 + $0x40] sm:$0xff]  ;;  %v641_v30 = vld [vmem:[#allocation2 + $0x68] sm:$0xff] }
 0x131   : > { %717 = vmatpush.bf16.msra.mxu0 %v1685_v34  ;;  %1723 = vmatpush.bf16.msra.mxu1 %v1685_v34  ;;  %v612_v52 = vcvt.s32.f32 %v596_v43  ;;  %v613_v53 = vcvt.s32.f32 %v597_v44  ;;  %v616_v54 = vcvt.s32.f32 %v600_v45  ;;  %v617_v55 = vcvt.s32.f32 %v601_v46  ;;  %v640_v22 = vld [vmem:[#allocation2 + $0x50] sm:$0xff]  ;;  %v648_v28 = vld [vmem:[#allocation2 + $0x60] sm:$0xff] }
 0x132   : > { %1724 = vmatpush.bf16.msra.mxu2 %v1685_v34  ;;  %1725 = vmatpush.bf16.msra.mxu3 %v1685_v34  ;;  %v620_v57 = vcvt.s32.f32 %v604_v48  ;;  %v621_v58 = vcvt.s32.f32 %v605_v49  ;;  %v624_v59 = vcvt.s32.f32 %v608_v50  ;;  %v625_v60 = vcvt.s32.f32 %v609_v51  ;;  %v637_v29 = vld [vmem:[#allocation2] sm:$0xff]  ;;  %v646_v51 = vld [vmem:[#allocation2 + $0x10] sm:$0xff]  ;;  %p1622_p1 = scmp.ne.s32.totalorder %s3123_s7, 1 }
 0x133   : > { %v628_v61 = vpack.c.bf16 %v613_v53, %v612_v52  ;;  %v630_v62 = vpack.c.bf16 %v617_v55, %v616_v54  ;;  %v598_v1 = vunpack.c.2.s8 %v592_v39  ;;  %v599_v2 = vunpack.c.3.s8 %v592_v39  ;;  %v645_v39 = vld [vmem:[#allocation2 + $0x20] sm:$0xff]  ;;  %v650_v52 = vld [vmem:[#allocation2 + $0x78] sm:$0xff]  ;;  %v643_v54 = vld [vmem:[#allocation2 + $0x48] sm:$0xff] }
 0x134   : > { %v632_v63 = vpack.c.bf16 %v621_v58, %v620_v57  ;;  %v634_v0 = vpack.c.bf16 %v625_v60, %v624_v59  ;;  %v602_v3 = vunpack.c.2.s8 %v593_v40  ;;  %v603_v4 = vunpack.c.3.s8 %v593_v40  ;;  %v649_v40 = vld [vmem:[#allocation2 + $0x70] sm:$0xff]  ;;  %v639_v53 = vld [vmem:[#allocation2 + $0x18] sm:$0xff] }
 0x135   : > { %718 = vmatpush.bf16.msra.mxu0 %v1684_v35  ;;  %1726 = vmatpush.bf16.msra.mxu1 %v1684_v35  ;;  %v606_v5 = vunpack.c.2.s8 %v594_v41  ;;  %v607_v6 = vunpack.c.3.s8 %v594_v41  ;;  %v610_v7 = vunpack.c.2.s8 %v595_v42  ;;  %v611_v8 = vunpack.c.3.s8 %v595_v42  ;;  %v638_v41 = vld [vmem:[#allocation2 + $0x58] sm:$0xff]  ;;  %v642_v42 = vld [vmem:[#allocation2 + $0x8] sm:$0xff] }
 0x136   : > { %1727 = vmatpush.bf16.msra.mxu2 %v1684_v35  ;;  %1728 = vmatpush.bf16.msra.mxu3 %v1684_v35  ;;  %v614_v9 = vcvt.s32.f32 %v598_v1  ;;  %v615_v10 = vcvt.s32.f32 %v599_v2  ;;  %v618_v11 = vcvt.s32.f32 %v602_v3  ;;  %v619_v12 = vcvt.s32.f32 %v603_v4 }
 0x137   : > { %v622_v13 = vcvt.s32.f32 %v606_v5  ;;  %v623_v14 = vcvt.s32.f32 %v607_v6  ;;  %v626_v15 = vcvt.s32.f32 %v610_v7  ;;  %v627_v16 = vcvt.s32.f32 %v611_v8 }
 0x138   : > { %v629_v17 = vpack.c.bf16 %v615_v10, %v614_v9  ;;  %v631_v18 = vpack.c.bf16 %v619_v12, %v618_v11 }
 0x139   : > { %719 = vmatpush.bf16.msra.mxu0 %v1683_v36  ;;  %1729 = vmatpush.bf16.msra.mxu1 %v1683_v36  ;;  %v633_v19 = vpack.c.bf16 %v623_v14, %v622_v13  ;;  %v635_v20 = vpack.c.bf16 %v627_v16, %v626_v15 }
 0x13a   : > { %1730 = vmatpush.bf16.msra.mxu2 %v1683_v36  ;;  %1731 = vmatpush.bf16.msra.mxu3 %v1683_v36 }
 0x13d   : > { %720 = vmatpush.bf16.msra.mxu0 %v1682_v37  ;;  %1732 = vmatpush.bf16.msra.mxu1 %v1682_v37 }
 0x13e   : > { %1733 = vmatpush.bf16.msra.mxu2 %v1682_v37  ;;  %1734 = vmatpush.bf16.msra.mxu3 %v1682_v37 }
 0x141   : > { %721 = vmatpush.bf16.msra.mxu0 %v1681_v38  ;;  %1735 = vmatpush.bf16.msra.mxu1 %v1681_v38 }
 0x142   : > { %1736 = vmatpush.bf16.msra.mxu2 %v1681_v38  ;;  %1737 = vmatpush.bf16.msra.mxu3 %v1681_v38 }
 0x145   : > { %722 = vmatpush.bf16.msra.mxu0 %v1680_v47  ;;  %1738 = vmatpush.bf16.msra.mxu1 %v1680_v47 }
 0x146   : > { %1739 = vmatpush.bf16.msra.mxu2 %v1680_v47  ;;  %1740 = vmatpush.bf16.msra.mxu3 %v1680_v47 }
 0x149   : > { %723 = vmatpush.bf16.msra.mxu0 %v1679_v56  ;;  %1741 = vmatpush.bf16.msra.mxu1 %v1679_v56 }
 0x14a   : > { %1742 = vmatpush.bf16.msra.mxu2 %v1679_v56  ;;  %1743 = vmatpush.bf16.msra.mxu3 %v1679_v56 }
 0x14c   : > { %724 = vmatmul.bf16.vlgmr.msra.gmra.mxu0 %v628_v61  ;;  %734 = vmatmul.bf16.vlgmr.msra.gmra.mxu1 %v630_v62 }
 0x14d   : > { %744 = vmatmul.bf16.vlgmr.msra.gmra.mxu2 %v632_v63  ;;  %754 = vmatmul.bf16.vlgmr.msra.gmra.mxu3 %v634_v0  ;;  %v647_v63 = vld [vmem:[#allocation2 + $0x38] sm:$0xff]  ;;  %v651_v0 = vld [vmem:[#allocation2 + $0x28] sm:$0xff] }
 0x15c   : > { %729 = vmatmul.bf16.gmra.mxu0 %v629_v17  ;;  %739 = vmatmul.bf16.gmra.mxu1 %v631_v18 }
 0x15d   : > { %749 = vmatmul.bf16.gmra.mxu2 %v633_v19  ;;  %759 = vmatmul.bf16.gmra.mxu3 %v635_v20 }
 0x1c9   : > { %v725_v23 = vpop.f32.mrf.mxu0  ;;  %v735_v24 = vpop.f32.mrf.mxu1 }
 0x1ca   : > { %v765_v25 = vadd.f32 %v725_v23, %v636_v21  ;;  %v769_v26 = vadd.f32 %v735_v24, %v640_v22 }
 0x1cc   : > { %781 = vst [vmem:[#allocation2 + $0x30] sm:$0xff] %v765_v25 }
 0x1cd   : > { %785 = vst [vmem:[#allocation2 + $0x50] sm:$0xff] %v769_v26 }
 0x1d0   : > { %v745_v31 = vpop.f32.mrf.mxu2  ;;  %v755_v32 = vpop.f32.mrf.mxu3 }
 0x1d1   : > { %v773_v33 = vadd.f32 %v745_v31, %v644_v27  ;;  %v777_v34 = vadd.f32 %v755_v32, %v648_v28  ;;  %v727_v35 = vpop.f32.mrf.mxu0  ;;  %v737_v36 = vpop.f32.mrf.mxu1 }
 0x1d2   : > { %v766_v37 = vadd.f32 %v727_v35, %v637_v29  ;;  %v770_v38 = vadd.f32 %v737_v36, %v641_v30 }
 0x1d3   : > { %789 = vst [vmem:[#allocation2 + $0x40] sm:$0xff] %v773_v33 }
 0x1d4   : > { %793 = vst [vmem:[#allocation2 + $0x60] sm:$0xff] %v777_v34 }
 0x1d5   : > { %782 = vst [vmem:[#allocation2] sm:$0xff] %v766_v37 }
 0x1d6   : > { %786 = vst [vmem:[#allocation2 + $0x68] sm:$0xff] %v770_v38 }
 0x1d8   : > { %v747_v43 = vpop.f32.mrf.mxu2  ;;  %v757_v44 = vpop.f32.mrf.mxu3 }
 0x1d9   : > { %v774_v45 = vadd.f32 %v747_v43, %v645_v39  ;;  %v778_v46 = vadd.f32 %v757_v44, %v649_v40  ;;  %v730_v47 = vpop.f32.mrf.mxu0  ;;  %v740_v48 = vpop.f32.mrf.mxu1 }
 0x1da   : > { %v767_v49 = vadd.f32 %v730_v47, %v638_v41  ;;  %v771_v50 = vadd.f32 %v740_v48, %v642_v42 }
 0x1db   : > { %790 = vst [vmem:[#allocation2 + $0x20] sm:$0xff] %v774_v45 }
 0x1dc   : > { %794 = vst [vmem:[#allocation2 + $0x70] sm:$0xff] %v778_v46 }
 0x1dd   : > { %783 = vst [vmem:[#allocation2 + $0x58] sm:$0xff] %v767_v49 }
 0x1de   : > { %787 = vst [vmem:[#allocation2 + $0x8] sm:$0xff] %v771_v50 }
 0x1e0   : > { %v750_v55 = vpop.f32.mrf.mxu2  ;;  %v760_v56 = vpop.f32.mrf.mxu3 }
 0x1e1   : > { %v775_v57 = vadd.f32 %v750_v55, %v646_v51  ;;  %v779_v58 = vadd.f32 %v760_v56, %v650_v52  ;;  %v732_v59 = vpop.f32.mrf.mxu0  ;;  %v742_v60 = vpop.f32.mrf.mxu1 }
 0x1e2   : > { %v768_v61 = vadd.f32 %v732_v59, %v639_v53  ;;  %v772_v62 = vadd.f32 %v742_v60, %v643_v54 }
 0x1e3   : > { %791 = vst [vmem:[#allocation2 + $0x10] sm:$0xff] %v775_v57 }
 0x1e4   : > { %795 = vst [vmem:[#allocation2 + $0x78] sm:$0xff] %v779_v58 }
 0x1e5   : > { %784 = vst [vmem:[#allocation2 + $0x18] sm:$0xff] %v768_v61 }
 0x1e6   : > { %788 = vst [vmem:[#allocation2 + $0x48] sm:$0xff] %v772_v62 }
 0x1e8   : > { %v752_v1 = vpop.f32.mrf.mxu2  ;;  %v762_v2 = vpop.f32.mrf.mxu3  ;;  %800 = sbr.rel (%p1622_p1) target bundleno = 816 (0x330), region = 68 }
 0x1e9   : > { %v776_v3 = vadd.f32 %v752_v1, %v647_v63  ;;  %v780_v4 = vadd.f32 %v762_v2, %v651_v0 }
 0x1eb   : > { %792 = vst [vmem:[#allocation2 + $0x38] sm:$0xff] %v776_v3 }
 0x1ec   : > { %796 = vst [vmem:[#allocation2 + $0x28] sm:$0xff] %v780_v4 }
 0x1ed   : > { %v2626_v5 = vld [vmem:[#allocation2 + $0x60] sm:$0xff]  ;;  %v2630_v7 = vld [vmem:[#allocation2 + $0x30] sm:$0xff]  ;;  %v2287_v8 = vmov 16   ;;  %v2684_v39 = vld [vmem:[#allocation2 + $0x68] sm:$0xff] }
 0x1ee   : > { %v2628_v6 = vld [vmem:[#allocation2 + $0x40] sm:$0xff]  ;;  %1936 = vset.pattern.permute.xlu2 %v2287_v8  ;;  %1935 = vset.pattern.permute.xlu1 %v2287_v8  ;;  %v829_v9 = vadd.f32 1.0, %v2626_v5  ;;  %v2637_v11 = vadd.f32 1.0, %v2630_v7  ;;  %v2639_v12 = vld [vmem:[#allocation2 + $0x70] sm:$0xff]  ;;  %v2696_v51 = vadd.f32 1.0, %v2684_v39 }
 0x1ef   : > { %v2634_v10 = vadd.f32 1.0, %v2628_v6  ;;  %v2641_v13 = vld [vmem:[#allocation2 + $0x20] sm:$0xff]  ;;  %1934 = vset.pattern.permute.xlu0 %v2287_v8  ;;  %v2644_v14 = vadd.f32 1.0, %v2639_v12  ;;  %v2688_v42 = vld [vmem:[#allocation2 + $0x50] sm:$0xff] }
 0x1f0   : > { %1937 = vrcp.f32 %v829_v9  ;;  %v2646_v15 = vld [vmem:[#allocation2] sm:$0xff]  ;;  %v1022_v16 = vand.u32 2147483647, %v829_v9  ;;  %v1024_v17 = vand.u32 2147483648, %v829_v9  ;;  %v2650_v18 = vadd.f32 1.0, %v2641_v13 }
 0x1f1   : > { %1939 = vrcp.f32 %v2634_v10  ;;  %v962_v19 = vand.u32 2147483647, %v2634_v10  ;;  %v964_v20 = vand.u32 2147483648, %v2634_v10  ;;  %v842_v21 = vand.u32 2147483647, %v2637_v11 }
 0x1f2   : > { %1941 = vrcp.f32 %v2637_v11  ;;  %v844_v22 = vand.u32 2147483648, %v2637_v11  ;;  %v2658_v23 = vadd.f32 1.0, %v2646_v15  ;;  %vm1018_vm0 = vweird.f32 %v829_v9 }
 0x1f3   : > { %vm958_vm1 = vweird.f32 %v2634_v10  ;;  %1943 = vrcp.f32 %v2644_v14  ;;  %vm2662_vm2 = vcmp.eq.f32.partialorder %v1022_v16, 8.507059e+37  ;;  %v1025_v25 = vor.u32 1.1754944e-38, %v1024_v17 }
 0x1f4   : > { %vm838_vm3 = vweird.f32 %v2637_v11  ;;  %1945 = vrcp.f32 %v2650_v18  ;;  %vm2668_vm4 = vcmp.eq.f32.partialorder %v962_v19, 8.507059e+37  ;;  %v965_v28 = vor.u32 1.1754944e-38, %v964_v20 }
 0x1f5   : > { %vm1033_vm5 = vweird.f32 %v2644_v14  ;;  %v1037_v29 = vand.u32 2147483647, %v2644_v14  ;;  %v1039_v30 = vand.u32 2147483648, %v2644_v14  ;;  %vm2675_vm6 = vcmp.eq.f32.partialorder %v842_v21, 8.507059e+37 }
 0x1f6   : > { %v1938_v26 = vpop.eup %1937  ;;  %v845_v34 = vor.u32 1.1754944e-38, %v844_v22  ;;  %vm973_vm7 = vweird.f32 %v2650_v18  ;;  %1947 = vrcp.f32 %v2658_v23  ;;  %v977_v37 = vand.u32 2147483647, %v2650_v18 }
 0x1f7   : > { %v1940_v31 = vpop.eup %1939  ;;  %v1014_v32 = vmul.f32 %v1938_v26, %v829_v9  ;;  %vm1019_vm8 = vweird.f32 %v1938_v26  ;;  %v979_v38 = vand.u32 2147483648, %v2650_v18  ;;  %vm853_vm10 = vweird.f32 %v2658_v23 }
 0x1f8   : > { %v1942_v35 = vpop.eup %1941  ;;  %v954_v36 = vmul.f32 %v1940_v31, %v2634_v10  ;;  %vm959_vm9 = vweird.f32 %v1940_v31  ;;  %v857_v45 = vand.u32 2147483647, %v2658_v23  ;;  %v859_v46 = vand.u32 2147483648, %v2658_v23  ;;  %vm2700_vm12 = vmor %vm1018_vm0, %vm1019_vm8 }
 0x1f9   : > { %v1015_v40 = vsub.f32 1.0, %v1014_v32  ;;  %v834_v41 = vmul.f32 %v1942_v35, %v2637_v11  ;;  %v1944_v43 = vpop.eup %1943  ;;  %vm839_vm11 = vweird.f32 %v1942_v35  ;;  %v2707_v55 = vadd.f32 1.0, %v2688_v42  ;;  %vm2712_vm14 = vmor %vm958_vm1, %vm959_vm9 }
 0x1fa   : > { %v955_v44 = vsub.f32 1.0, %v954_v36  ;;  %v2692_v47 = vpop.eup %1945  ;;  %v1029_v50 = vmul.f32 %v1944_v43, %v2644_v14  ;;  %vm1034_vm13 = vweird.f32 %v1944_v43  ;;  %vm2720_vm0 = vmor %vm838_vm3, %vm839_vm11  ;;  %1949 = vrcp.f32 %v2696_v51  ;;  %v1694_v14 = vld [vmem:[#allocation11 + $0x38] sm:$0xff] }
 0x1fb   : > { %v1016_v48 = vmul.f32 %v1938_v26, %v1015_v40  ;;  %v835_v49 = vsub.f32 1.0, %v834_v41  ;;  %v969_v54 = vmul.f32 %v2692_v47, %v2650_v18  ;;  %vm974_vm15 = vweird.f32 %v2692_v47  ;;  %vm2735_vm1 = vmor %vm1033_vm5, %vm1034_vm13  ;;  %1257 = vmatpush.bf16.msra.mxu0 %v1694_v14  ;;  %1745 = vmatpush.bf16.msra.mxu2 %v1694_v14 }
 0x1fc   : > { %v956_v53 = vmul.f32 %v1940_v31, %v955_v44  ;;  %v1948_v56 = vpop.eup %1947  ;;  %v1030_v60 = vsub.f32 1.0, %v1029_v50  ;;  %v1040_v20 = vor.u32 1.1754944e-38, %v1039_v30  ;;  %vm2756_vm3 = vcmp.eq.f32.partialorder %v1037_v29, 8.507059e+37  ;;  %v2775_v29 = vld [vmem:[#allocation2 + $0x10] sm:$0xff]  ;;  %1746 = vmatpush.bf16.msra.mxu3 %v1694_v14  ;;  %1744 = vmatpush.bf16.msra.mxu1 %v1694_v14 }
 0x1fd   : > { %v1017_v57 = vadd.f32 %v1938_v26, %v1016_v48  ;;  %v836_v59 = vmul.f32 %v1942_v35, %v835_v49  ;;  %v970_v63 = vsub.f32 1.0, %v969_v54  ;;  %v849_v0 = vmul.f32 %v1948_v56, %v2658_v23  ;;  %v2808_v49 = vld [vmem:[#allocation2 + $0x38] sm:$0xff] }
 0x1fe   : > { %v957_v61 = vadd.f32 %v1940_v31, %v956_v53  ;;  %vm854_vm8 = vweird.f32 %v1948_v56  ;;  %v1031_v3 = vmul.f32 %v1944_v43, %v1030_v60  ;;  %1951 = vrcp.f32 %v2707_v55 }
 0x1ff   : > { %v1021_v1 = vsel %vm2700_vm12, %v1938_v26, %v1017_v57  ;;  %v837_v2 = vadd.f32 %v1942_v35, %v836_v59  ;;  %v971_v10 = vmul.f32 %v2692_v47, %v970_v63  ;;  %v850_v11 = vsub.f32 1.0, %v849_v0  ;;  %vm2770_vm5 = vmor %vm853_vm10, %vm854_vm8 }
 0x200   : > { %v1026_v4 = vsel %vm2662_vm2, %v1025_v25, %v1021_v1  ;;  %v961_v8 = vsel %vm2712_vm14, %v1940_v31, %v957_v61  ;;  %v1032_v19 = vadd.f32 %v1944_v43, %v1031_v3  ;;  %vm2748_vm2 = vmor %vm973_vm7, %vm974_vm15  ;;  %v860_v33 = vor.u32 1.1754944e-38, %v859_v46  ;;  %v1950_v23 = vpop.eup %1949  ;;  %v2836_v1 = vld [vmem:[#allocation2 + $0x18] sm:$0xff] }
 0x201   : > { %1135 = vperm.xlu1 %1935, %v1026_v4   ;;  %v966_v16 = vsel %vm2668_vm4, %v965_v28, %v961_v8  ;;  %v841_v17 = vsel %vm2720_vm0, %v1942_v35, %v837_v2  ;;  %v972_v25 = vadd.f32 %v2692_v47, %v971_v10  ;;  %v851_v26 = vmul.f32 %v1948_v56, %v850_v11 }
 0x202   : > { %1115 = vperm.xlu0 %1934, %v966_v16   ;;  %v846_v22 = vsel %vm2675_vm6, %v845_v34, %v841_v17  ;;  %v1036_v18 = vsel %vm2735_vm1, %v1944_v43, %v1032_v19  ;;  %vm2763_vm4 = vcmp.eq.f32.partialorder %v977_v37, 8.507059e+37  ;;  %v980_v28 = vor.u32 1.1754944e-38, %v979_v38  ;;  %v2784_v34 = vld [vmem:[#allocation2 + $0x78] sm:$0xff] }
 0x203   : > { %1075 = vperm.xlu2 %1936, %v846_v22   ;;  %v976_v30 = vsel %vm2748_vm2, %v2692_v47, %v972_v25  ;;  %v852_v31 = vadd.f32 %v1948_v56, %v851_v26  ;;  %vm2780_vm6 = vcmp.eq.f32.partialorder %v857_v45, 8.507059e+37  ;;  %v1041_v35 = vsel %vm2756_vm3, %v1040_v20, %v1036_v18 }
 0x204   : > { %v917_v36 = vand.u32 2147483647, %v2696_v51  ;;  %v919_v37 = vand.u32 2147483648, %v2696_v51  ;;  %v902_v38 = vand.u32 2147483647, %v2707_v55  ;;  %v909_v41 = vmul.f32 %v1950_v23, %v2696_v51  ;;  %v1952_v50 = vpop.eup %1951 }
 0x205   : > { %v856_v40 = vsel %vm2770_vm5, %v1948_v56, %v852_v31  ;;  %v904_v43 = vand.u32 2147483648, %v2707_v55  ;;  %v2796_v44 = vadd.f32 1.0, %v2775_v29  ;;  %v981_v45 = vsel %vm2763_vm4, %v980_v28, %v976_v30  ;;  %v2816_v56 = vld [vmem:[#allocation2 + $0x28] sm:$0xff] }
 0x206   : > { %vm913_vm7 = vweird.f32 %v2696_v51  ;;  %vm898_vm9 = vweird.f32 %v2707_v55  ;;  %v2803_v46 = vadd.f32 1.0, %v2784_v34  ;;  %v861_v47 = vsel %vm2780_vm6, %v860_v33, %v856_v40 }
 0x207   : > { %v910_v48 = vsub.f32 1.0, %v909_v41  ;;  %vm914_vm10 = vweird.f32 %v1950_v23  ;;  %1953 = vrcp.f32 %v2796_v44  ;;  %vm2810_vm11 = vcmp.eq.f32.partialorder %v917_v36, 8.507059e+37 }
 0x208   : > { %v920_v53 = vor.u32 1.1754944e-38, %v919_v37  ;;  %v992_v54 = vand.u32 2147483647, %v2796_v44  ;;  %1955 = vrcp.f32 %v2803_v46  ;;  %v894_v58 = vmul.f32 %v1952_v50, %v2707_v55  ;;  %vm2826_vm13 = vmor %vm913_vm7, %vm914_vm10  ;;  %v2880_v37 = vld [vmem:[#allocation2 + $0x58] sm:$0xff] }
 0x209   : > { %1140 = vperm.xlu1 %1935, %v1041_v35   ;;  %v911_v57 = vmul.f32 %v1950_v23, %v910_v48  ;;  %vm2819_vm12 = vcmp.eq.f32.partialorder %v902_v38, 8.507059e+37  ;;  %v905_v60 = vor.u32 1.1754944e-38, %v904_v43  ;;  %vm988_vm14 = vweird.f32 %v2796_v44 }
 0x20a   : > { %1120 = vperm.xlu0 %1934, %v981_v45   ;;  %v994_v62 = vand.u32 2147483648, %v2796_v44  ;;  %v1052_v63 = vand.u32 2147483647, %v2803_v46  ;;  %v2834_v0 = vadd.f32 1.0, %v2808_v49  ;;  %v895_v3 = vsub.f32 1.0, %v894_v58 }
 0x20b   : > { %1080 = vperm.xlu2 %1936, %v861_v47   ;;  %v912_v2 = vadd.f32 %v1950_v23, %v911_v57  ;;  %vm899_vm15 = vweird.f32 %v1952_v50  ;;  %v2839_v51 = vadd.f32 1.0, %v2816_v56  ;;  %vm2841_vm0 = vcmp.eq.f32.partialorder %v992_v54, 8.507059e+37  ;;  %v2892_v47 = vld [vmem:[#allocation2 + $0x8] sm:$0xff] }
 0x20c   : > { %vm1048_vm8 = vweird.f32 %v2803_v46  ;;  %v1054_v8 = vand.u32 2147483648, %v2803_v46  ;;  %1957 = vrcp.f32 %v2834_v0  ;;  %v896_v11 = vmul.f32 %v1952_v50, %v895_v3  ;;  %vm2858_vm1 = vmor %vm898_vm9, %vm899_vm15 }
 0x20d   : > { %v1954_v9 = vpop.eup %1953  ;;  %v916_v10 = vsel %vm2826_vm13, %v1950_v23, %v912_v2  ;;  %1959 = vrcp.f32 %v2839_v51  ;;  %v2852_v16 = vadd.f32 1.0, %v2836_v1  ;;  %v1007_v22 = vand.u32 2147483647, %v2834_v0 }
 0x20e   : > { %v1956_v17 = vpop.eup %1955  ;;  %v921_v19 = vsel %vm2810_vm11, %v920_v53, %v916_v10  ;;  %v984_v21 = vmul.f32 %v1954_v9, %v2796_v44  ;;  %v1009_v24 = vand.u32 2147483648, %v2834_v0  ;;  %v897_v25 = vadd.f32 %v1952_v50, %v896_v11  ;;  %v1692_v11 = vld [vmem:[#allocation11 + $0x28] sm:$0xff] }
 0x20f   : > { %v995_v26 = vor.u32 1.1754944e-38, %v994_v62  ;;  %v1044_v18 = vmul.f32 %v1956_v17, %v2803_v46  ;;  %vm2866_vm2 = vcmp.eq.f32.partialorder %v1052_v63, 8.507059e+37  ;;  %vm989_vm3 = vweird.f32 %v1954_v9 }
 0x210   : > { %v985_v55 = vsub.f32 1.0, %v984_v21  ;;  %v1055_v28 = vor.u32 1.1754944e-38, %v1054_v8  ;;  %vm1003_vm4 = vweird.f32 %v2834_v0  ;;  %v901_v30 = vsel %vm2858_vm1, %v1952_v50, %v897_v25  ;;  %vm2885_vm7 = vmor %vm988_vm14, %vm989_vm3 }
 0x211   : > { %1100 = vperm.xlu1 %1935, %v921_v19   ;;  %v1045_v31 = vsub.f32 1.0, %v1044_v18  ;;  %vm1049_vm5 = vweird.f32 %v1956_v17  ;;  %1961 = vrcp.f32 %v2852_v16  ;;  %v906_v33 = vsel %vm2819_vm12, %v905_v60, %v901_v30 }
 0x212   : > { %v1958_v32 = vpop.eup %1957  ;;  %v986_v23 = vmul.f32 %v1954_v9, %v985_v55  ;;  %vm2876_vm6 = vcmp.eq.f32.partialorder %v1007_v22, 8.507059e+37  ;;  %v1010_v36 = vor.u32 1.1754944e-38, %v1009_v24  ;;  %1095 = vperm.xlu0 %1934, %v906_v33   ;;  %vm1063_vm9 = vweird.f32 %v2839_v51  ;;  %vm2897_vm10 = vmor %vm1048_vm8, %vm1049_vm5  ;;  %v2937_v22 = vld [vmem:[#allocation2 + $0x48] sm:$0xff] }
 0x213   : > { %v1960_v38 = vpop.eup %1959  ;;  %v1046_v41 = vmul.f32 %v1956_v17, %v1045_v31  ;;  %v999_v43 = vmul.f32 %v1958_v32, %v2834_v0  ;;  %v1067_v45 = vand.u32 2147483647, %v2839_v51  ;;  %v1069_v52 = vand.u32 2147483648, %v2839_v51 }
 0x214   : > { %v987_v48 = vadd.f32 %v1954_v9, %v986_v23  ;;  %v1059_v50 = vmul.f32 %v1960_v38, %v2839_v51  ;;  %vm883_vm11 = vweird.f32 %v2852_v16  ;;  %vm1004_vm12 = vweird.f32 %v1958_v32 }
 0x215   : > { %v1047_v53 = vadd.f32 %v1956_v17, %v1046_v41  ;;  %v1000_v54 = vsub.f32 1.0, %v999_v43  ;;  %v819_v57 = vadd.f32 1.0, %v2880_v37  ;;  %vm1064_vm13 = vweird.f32 %v1960_v38  ;;  %vm2918_vm14 = vmor %vm1003_vm4, %vm1004_vm12 }
 0x216   : > { %v991_v58 = vsel %vm2885_vm7, %v1954_v9, %v987_v48  ;;  %v1060_v46 = vsub.f32 1.0, %v1059_v50  ;;  %v2908_v59 = vadd.f32 1.0, %v2892_v47  ;;  %vm2922_vm15 = vcmp.eq.f32.partialorder %v1067_v45, 8.507059e+37 }
 0x217   : > { %v1962_v60 = vpop.eup %1961  ;;  %v996_v61 = vsel %vm2841_vm0, %v995_v26, %v991_v58  ;;  %v1051_v62 = vsel %vm2897_vm10, %v1956_v17, %v1047_v53  ;;  %v1001_v63 = vmul.f32 %v1958_v32, %v1000_v54  ;;  %1963 = vrcp.f32 %v819_v57  ;;  %vm2930_vm0 = vmor %vm1063_vm9, %vm1064_vm13 }
 0x218   : > { %1125 = vperm.xlu2 %1936, %v996_v61   ;;  %v1056_v2 = vsel %vm2866_vm2, %v1055_v28, %v1051_v62  ;;  %v1061_v8 = vmul.f32 %v1960_v38, %v1060_v46  ;;  %v879_v4 = vmul.f32 %v1962_v60, %v2852_v16  ;;  %v1070_v0 = vor.u32 1.1754944e-38, %v1069_v52 }
 0x219   : > { %1145 = vperm.xlu1 %1935, %v1056_v2   ;;  %v1002_v10 = vadd.f32 %v1958_v32, %v1001_v63  ;;  %v887_v17 = vand.u32 2147483647, %v2852_v16  ;;  %v889_v19 = vand.u32 2147483648, %v2852_v16  ;;  %vm884_vm8 = vweird.f32 %v1962_v60 }
 0x21a   : > { %v1062_v20 = vadd.f32 %v1960_v38, %v1061_v8  ;;  %v880_v21 = vsub.f32 1.0, %v879_v4  ;;  %1965 = vrcp.f32 %v2908_v59  ;;  %vm2949_vm1 = vmor %vm883_vm11, %vm884_vm8  ;;  %v824_v14 = vadd.f32 1.0, %v2937_v22 }
 0x21b   : > { %v1006_v24 = vsel %vm2918_vm14, %v1958_v32, %v1002_v10  ;;  %v890_v28 = vor.u32 1.1754944e-38, %v889_v19  ;;  %vm888_vm2 = vcmp.eq.f32.partialorder %v887_v17, 8.507059e+37  ;;  %vm868_vm3 = vweird.f32 %v819_v57  ;;  %v1693_v10 = vld [vmem:[#allocation11 + $0x30] sm:$0xff]  ;;  %v1690_v17 = vld [vmem:[#allocation11 + $0x18] sm:$0xff] }
 0x21c   : > { %v1011_v51 = vsel %vm2876_vm6, %v1010_v36, %v1006_v24  ;;  %v1066_v25 = vsel %vm2930_vm0, %v1960_v38, %v1062_v20  ;;  %v881_v26 = vmul.f32 %v1962_v60, %v880_v21  ;;  %v874_v32 = vand.u32 2147483648, %v819_v57  ;;  %1258 = vmatpush.bf16.msra.mxu0 %v1693_v10  ;;  %1748 = vmatpush.bf16.msra.mxu2 %v1693_v10  ;;  %v1689_v19 = vld [vmem:[#allocation11 + $0x10] sm:$0xff]  ;;  %v1688_v20 = vld [vmem:[#allocation11 + $0x8] sm:$0xff]  ;;  %v1687_v21 = vld [vmem:[#allocation11] sm:$0xff] }
 0x21d   : > { %v1964_v18 = vpop.eup %1963  ;;  %1130 = vperm.xlu0 %1934, %v1011_v51   ;;  %v1071_v27 = vsel %vm2922_vm15, %v1070_v0, %v1066_v25  ;;  %1967 = vrcp.f32 %v824_v14  ;;  %v872_v16 = vand.u32 2147483647, %v819_v57  ;;  %vm928_vm5 = vweird.f32 %v2908_v59  ;;  %1749 = vmatpush.bf16.msra.mxu3 %v1693_v10  ;;  %v1691_v0 = vld [vmem:[#allocation11 + $0x20] sm:$0xff] }
 0x21e   : > { %v882_v30 = vadd.f32 %v1962_v60, %v881_v26  ;;  %v864_v31 = vmul.f32 %v1964_v18, %v819_v57  ;;  %vm869_vm4 = vweird.f32 %v1964_v18  ;;  %v934_v41 = vand.u32 2147483648, %v2908_v59  ;;  %1747 = vmatpush.bf16.msra.mxu1 %v1693_v10 }
 0x21f   : > { %vm870_vm6 = vmor %vm868_vm3, %vm869_vm4  ;;  %v875_v43 = vor.u32 1.1754944e-38, %v874_v32  ;;  %v932_v48 = vand.u32 2147483647, %v2908_v59  ;;  %vm873_vm9 = vcmp.eq.f32.partialorder %v872_v16, 8.507059e+37  ;;  %v949_v61 = vand.u32 2147483648, %v824_v14 }
 0x220   : > { %v1966_v33 = vpop.eup %1965  ;;  %1150 = vperm.xlu2 %1936, %v1071_v27   ;;  %v886_v23 = vsel %vm2949_vm1, %v1962_v60, %v882_v30  ;;  %v865_v35 = vsub.f32 1.0, %v864_v31  ;;  %v935_v54 = vor.u32 1.1754944e-38, %v934_v41  ;;  %vm943_vm12 = vweird.f32 %v824_v14  ;;  %1259 = vmatpush.bf16.msra.mxu0 %v1692_v11 }
 0x221   : > { %v891_v36 = vsel %vm888_vm2, %v890_v28, %v886_v23  ;;  %v924_v38 = vmul.f32 %v1966_v33, %v2908_v59  ;;  %vm929_vm7 = vweird.f32 %v1966_v33  ;;  %vm933_vm11 = vcmp.eq.f32.partialorder %v932_v48, 8.507059e+37  ;;  %1751 = vmatpush.bf16.msra.mxu2 %v1692_v11  ;;  %1752 = vmatpush.bf16.msra.mxu3 %v1692_v11 }
 0x222   : > { %1090 = vperm.xlu1 %1935, %v891_v36   ;;  %v866_v40 = vmul.f32 %v1964_v18, %v865_v35  ;;  %vm930_vm10 = vmor %vm928_vm5, %vm929_vm7  ;;  %v947_v62 = vand.u32 2147483647, %v824_v14  ;;  %v950_v3 = vor.u32 1.1754944e-38, %v949_v61  ;;  %1750 = vmatpush.bf16.msra.mxu1 %v1692_v11 }
 0x223   : > { %v925_v45 = vsub.f32 1.0, %v924_v38  ;;  %v1968_v50 = vpop.eup %1967 }
 0x224   : > { %v867_v44 = vadd.f32 %v1964_v18, %v866_v40  ;;  %v939_v58 = vmul.f32 %v1968_v50, %v824_v14  ;;  %vm944_vm13 = vweird.f32 %v1968_v50  ;;  %vm948_vm15 = vcmp.eq.f32.partialorder %v947_v62, 8.507059e+37  ;;  %1260 = vmatpush.bf16.msra.mxu0 %v1691_v0 }
 0x225   : > { %v926_v52 = vmul.f32 %v1966_v33, %v925_v45  ;;  %vm945_vm14 = vmor %vm943_vm12, %vm944_vm13  ;;  %1754 = vmatpush.bf16.msra.mxu2 %v1691_v0  ;;  %1755 = vmatpush.bf16.msra.mxu3 %v1691_v0 }
 0x226   : > { %v871_v53 = vsel %vm870_vm6, %v1964_v18, %v867_v44  ;;  %v940_v57 = vsub.f32 1.0, %v939_v58  ;;  %1753 = vmatpush.bf16.msra.mxu1 %v1691_v0  ;;  %v1177_v58 = vld [vmem:[%s2586_s8] sm:$0xff] }
 0x227   : > { %v876_v46 = vsel %vm873_vm9, %v875_v43, %v871_v53  ;;  %v927_v60 = vadd.f32 %v1966_v33, %v926_v52 }
 0x228   : > { %1085 = vperm.xlu0 %1934, %v876_v46   ;;  %v941_v59 = vmul.f32 %v1968_v50, %v940_v57  ;;  %1261 = vmatpush.bf16.msra.mxu0 %v1690_v17  ;;  %v1189_v57 = vld [vmem:[%s2586_s8 + $0x60] sm:$0xff] }
 0x229   : > { %v931_v63 = vsel %vm930_vm10, %v1966_v33, %v927_v60  ;;  %1757 = vmatpush.bf16.msra.mxu2 %v1690_v17  ;;  %1758 = vmatpush.bf16.msra.mxu3 %v1690_v17 }
 0x22a   : > { %v936_v2 = vsel %vm933_vm11, %v935_v54, %v931_v63  ;;  %v942_v8 = vadd.f32 %v1968_v50, %v941_v59  ;;  %1756 = vmatpush.bf16.msra.mxu1 %v1690_v17  ;;  %v1181_v59 = vld [vmem:[%s2586_s8 + $0x20] sm:$0xff] }
 0x22b   : > { %1105 = vperm.xlu2 %1936, %v936_v2  }
 0x22c   : > { %v946_v9 = vsel %vm945_vm14, %v1968_v50, %v942_v8  ;;  %1262 = vmatpush.bf16.msra.mxu0 %v1689_v19 }
 0x22d   : > { %v951_v4 = vsel %vm948_vm15, %v950_v3, %v946_v9  ;;  %1760 = vmatpush.bf16.msra.mxu2 %v1689_v19  ;;  %1761 = vmatpush.bf16.msra.mxu3 %v1689_v19  ;;  %v1190_v9 = vld [vmem:[%s2586_s8 + $0x68] sm:$0xff] }
 0x22e   : > { %1759 = vmatpush.bf16.msra.mxu1 %v1689_v19  ;;  %v1182_v19 = vld [vmem:[%s2586_s8 + $0x28] sm:$0xff] }
 0x230   : > { %1110 = vperm.xlu0 %1934, %v951_v4   ;;  %1263 = vmatpush.bf16.msra.mxu0 %v1688_v20  ;;  %v1186_v4 = vld [vmem:[%s2586_s8 + $0x48] sm:$0xff] }
 0x231   : > { %1763 = vmatpush.bf16.msra.mxu2 %v1688_v20  ;;  %1764 = vmatpush.bf16.msra.mxu3 %v1688_v20 }
 0x232   : > { %1762 = vmatpush.bf16.msra.mxu1 %v1688_v20 }
 0x234   : > { %1264 = vmatpush.bf16.msra.mxu0 %v1687_v21 }
 0x235   : > { %1766 = vmatpush.bf16.msra.mxu2 %v1687_v21  ;;  %1767 = vmatpush.bf16.msra.mxu3 %v1687_v21 }
 0x236   : > { %1765 = vmatpush.bf16.msra.mxu1 %v1687_v21 }
 0x25d   : > { %v1076_v24 = vpop.permute.xlu2 %1075 }
 0x25e   : > { %v1153_v51 = vmul.f32 %v1076_v24, %v2630_v7  ;;  %v1191_v24 = vld [vmem:[%s2586_s8 + $0x70] sm:$0xff] }
 0x265   : > { %v1081_v25 = vpop.permute.xlu2 %1080 }
 0x266   : > { %v1154_v26 = vmul.f32 %v1081_v25, %v2646_v15 }
 0x268   : > { %v1169_v18 = vpack.c.bf16 %v1154_v26, %v1153_v51  ;;  %v1187_v26 = vld [vmem:[%s2586_s8 + $0x50] sm:$0xff] }
 0x26a   : > { %1265 = vmatmul.bf16.vlgmr.msra.gmra.mxu0 %v1169_v18 }
 0x272   : > { %v1126_v7 = vpop.permute.xlu2 %1125 }
 0x273   : > { %v1136_v27 = vpop.permute.xlu1 %1135  ;;  %v1163_v45 = vmul.f32 %v1126_v7, %v2775_v29  ;;  %v1180_v7 = vld [vmem:[%s2586_s8 + $0x18] sm:$0xff] }
 0x274   : > { %v1116_v55 = vpop.permute.xlu0 %1115  ;;  %v1165_v28 = vmul.f32 %v1136_v27, %v2626_v5 }
 0x275   : > { %v1161_v32 = vmul.f32 %v1116_v55, %v2628_v6  ;;  %v1192_v55 = vld [vmem:[%s2586_s8 + $0x78] sm:$0xff] }
 0x27a   : > { %v1151_v40 = vpop.permute.xlu2 %1150 }
 0x27b   : > { %v1141_v14 = vpop.permute.xlu1 %1140  ;;  %v1168_v41 = vmul.f32 %v1151_v40, %v2816_v56  ;;  %v1184_v40 = vld [vmem:[%s2586_s8 + $0x38] sm:$0xff] }
 0x27c   : > { %v1166_v30 = vmul.f32 %v1141_v14, %v2639_v12  ;;  %v1121_v31 = vpop.permute.xlu0 %1120 }
 0x27d   : > { %v1162_v33 = vmul.f32 %v1121_v31, %v2641_v13 }
 0x27e   : > { %v1175_v23 = vpack.c.bf16 %v1166_v30, %v1165_v28  ;;  %v1179_v28 = vld [vmem:[%s2586_s8 + $0x10] sm:$0xff] }
 0x27f   : > { %v1173_v35 = vpack.c.bf16 %v1162_v33, %v1161_v32  ;;  %v1188_v33 = vld [vmem:[%s2586_s8 + $0x58] sm:$0xff] }
 0x280   : > { %1295 = vmatmul.bf16.vlgmr.msra.gmra.mxu3 %v1175_v23 }
 0x281   : > { %1285 = vmatmul.bf16.vlgmr.msra.gmra.mxu2 %v1173_v35 }
 0x283   : > { %v1101_v15 = vpop.permute.xlu1 %1100 }
 0x284   : > { %v1158_v16 = vmul.f32 %v1101_v15, %v2684_v39  ;;  %v1096_v36 = vpop.permute.xlu0 %1095  ;;  %v1183_v15 = vld [vmem:[%s2586_s8 + $0x30] sm:$0xff] }
 0x285   : > { %v1157_v38 = vmul.f32 %v1096_v36, %v2688_v42  ;;  %v1106_v29 = vpop.permute.xlu2 %1105 }
 0x287   : > { %v1171_v5 = vpack.c.bf16 %v1158_v16, %v1157_v38 }
 0x289   : > { %1275 = vmatmul.bf16.vlgmr.msra.gmra.mxu1 %v1171_v5 }
 0x28b   : > { %v1146_v12 = vpop.permute.xlu1 %1145 }
 0x28c   : > { %v1167_v6 = vmul.f32 %v1146_v12, %v2784_v34 }
 0x28e   : > { %v1176_v13 = vpack.c.bf16 %v1168_v41, %v1167_v6 }
 0x28f   : > { %v1131_v43 = vpop.permute.xlu0 %1130 }
 0x290   : > { %v1164_v48 = vmul.f32 %v1131_v43, %v2808_v49  ;;  %1300 = vmatmul.bf16.gmra.mxu3 %v1176_v13  ;;  %v1159_v49 = vmul.f32 %v1106_v29, %v2892_v47  ;;  %v1185_v47 = vld [vmem:[%s2586_s8 + $0x40] sm:$0xff] }
 0x292   : > { %v1174_v39 = vpack.c.bf16 %v1164_v48, %v1163_v45 }
 0x294   : > { %1290 = vmatmul.bf16.gmra.mxu2 %v1174_v39  ;;  %v1091_v42 = vpop.permute.xlu1 %1090 }
 0x295   : > { %v1156_v44 = vmul.f32 %v1091_v42, %v2836_v1 }
 0x29a   : > { %v1086_v50 = vpop.permute.xlu0 %1085 }
 0x29b   : > { %v1155_v56 = vmul.f32 %v1086_v50, %v2880_v37  ;;  %v1178_v37 = vld [vmem:[%s2586_s8 + $0x8] sm:$0xff] }
 0x29d   : > { %v1170_v34 = vpack.c.bf16 %v1156_v44, %v1155_v56 }
 0x29f   : > { %1270 = vmatmul.bf16.gmra.mxu0 %v1170_v34 }
 0x2a2   : > { %v1111_v52 = vpop.permute.xlu0 %1110 }
 0x2a3   : > { %v1160_v53 = vmul.f32 %v1111_v52, %v2937_v22 }
 0x2a5   : > { %v1172_v54 = vpack.c.bf16 %v1160_v53, %v1159_v49 }
 0x2a7   : > { %1280 = vmatmul.bf16.gmra.mxu1 %v1172_v54 }
 0x2e7   : > { %v1266_v1 = vpop.f32.mrf.mxu0 }
 0x2e8   : > { %v1306_v46 = vadd.f32 %v1266_v1, %v1177_v58 }
 0x2ea   : > { %1322 = vst [vmem:[%s2586_s8] sm:$0xff] %v1306_v46 }
 0x2ef   : > { %v1268_v60 = vpop.f32.mrf.mxu0 }
 0x2f0   : > { %v1307_v61 = vadd.f32 %v1268_v60, %v1178_v37 }
 0x2f2   : > { %1323 = vst [vmem:[%s2586_s8 + $0x8] sm:$0xff] %v1307_v61 }
 0x303   : > { %v1296_v62 = vpop.f32.mrf.mxu3 }
 0x304   : > { %v1286_v22 = vpop.f32.mrf.mxu2  ;;  %v1318_v63 = vadd.f32 %v1296_v62, %v1189_v57 }
 0x305   : > { %v1314_v2 = vadd.f32 %v1286_v22, %v1185_v47 }
 0x306   : > { %1334 = vst [vmem:[%s2586_s8 + $0x60] sm:$0xff] %v1318_v63  ;;  %v1276_v3 = vpop.f32.mrf.mxu1 }
 0x307   : > { %1330 = vst [vmem:[%s2586_s8 + $0x40] sm:$0xff] %v1314_v2  ;;  %v1310_v8 = vadd.f32 %v1276_v3, %v1181_v59 }
 0x309   : > { %1326 = vst [vmem:[%s2586_s8 + $0x20] sm:$0xff] %v1310_v8 }
 0x30b   : > { %v1298_v10 = vpop.f32.mrf.mxu3 }
 0x30c   : > { %v1288_v11 = vpop.f32.mrf.mxu2  ;;  %v1319_v0 = vadd.f32 %v1298_v10, %v1190_v9 }
 0x30d   : > { %v1315_v17 = vadd.f32 %v1288_v11, %v1186_v4 }
 0x30e   : > { %1335 = vst [vmem:[%s2586_s8 + $0x68] sm:$0xff] %v1319_v0  ;;  %v1278_v20 = vpop.f32.mrf.mxu1 }
 0x30f   : > { %1331 = vst [vmem:[%s2586_s8 + $0x48] sm:$0xff] %v1315_v17  ;;  %v1311_v21 = vadd.f32 %v1278_v20, %v1182_v19 }
 0x311   : > { %1327 = vst [vmem:[%s2586_s8 + $0x28] sm:$0xff] %v1311_v21 }
 0x313   : > { %v1301_v51 = vpop.f32.mrf.mxu3 }
 0x314   : > { %v1320_v25 = vadd.f32 %v1301_v51, %v1191_v24 }
 0x316   : > { %1336 = vst [vmem:[%s2586_s8 + $0x70] sm:$0xff] %v1320_v25 }
 0x317   : > { %v1291_v18 = vpop.f32.mrf.mxu2 }
 0x318   : > { %v1316_v27 = vadd.f32 %v1291_v18, %v1187_v26 }
 0x31a   : > { %1332 = vst [vmem:[%s2586_s8 + $0x50] sm:$0xff] %v1316_v27 }
 0x31b   : > { %v1303_v14 = vpop.f32.mrf.mxu3 }
 0x31c   : > { %v1271_v30 = vpop.f32.mrf.mxu0  ;;  %v1321_v31 = vadd.f32 %v1303_v14, %v1192_v55 }
 0x31d   : > { %v1308_v32 = vadd.f32 %v1271_v30, %v1179_v28 }
 0x31e   : > { %1337 = vst [vmem:[%s2586_s8 + $0x78] sm:$0xff] %v1321_v31 }
 0x31f   : > { %1324 = vst [vmem:[%s2586_s8 + $0x10] sm:$0xff] %v1308_v32  ;;  %v1293_v23 = vpop.f32.mrf.mxu2 }
 0x320   : > { %v1317_v35 = vadd.f32 %v1293_v23, %v1188_v33 }
 0x322   : > { %1333 = vst [vmem:[%s2586_s8 + $0x58] sm:$0xff] %v1317_v35 }
 0x324   : > { %v1273_v16 = vpop.f32.mrf.mxu0  ;;  %v1281_v36 = vpop.f32.mrf.mxu1 }
 0x325   : > { %v1309_v38 = vadd.f32 %v1273_v16, %v1180_v7  ;;  %v1312_v5 = vadd.f32 %v1281_v36, %v1183_v15 }
 0x327   : > { %1325 = vst [vmem:[%s2586_s8 + $0x18] sm:$0xff] %v1309_v38 }
 0x328   : > { %1328 = vst [vmem:[%s2586_s8 + $0x30] sm:$0xff] %v1312_v5 }
 0x32c   : > { %v1283_v12 = vpop.f32.mrf.mxu1 }
 0x32d   : > { %v1313_v41 = vadd.f32 %v1283_v12, %v1184_v40 }
 0x32f   : > { %1329 = vst [vmem:[%s2586_s8 + $0x38] sm:$0xff] %v1313_v41 }
 0x330 PF: > { %s3174_s4 = sld [smem:[#allocation20_spill]]  ;;  %s1351_s21 = sshll.u32 %s2586_s8, 4  ;;  %s1352_s21 = int_to_ptr.vmem [resolvable:$true] %s1351_s21 }
 0x331   : > { %s3175_s24 = sld [smem:[#allocation30_spill]]  ;;  %s1339_s1 = scalar_lea.sflag [#allocation5], %s2572_s12 }
 0x336   : > { %s1695_s14 = sshll.u32 %s3174_s4, 7 }
 0x337   : > { %s3176_s13 = smov %s3175_s24  ;;  %s1350_s28 = scalar_lea.hbm %s3175_s24, %s1695_s14 }
 0x338   : > { %s1353_s0 = sshll.u32 %s1350_s28, 4  ;;  %s2139_s16 = scalar_lea.hbm %s3176_s13, 256  ;;  %s1354_s0 = int_to_ptr.hbm [resolvable:$true] %s1353_s0 }
 0x339   : > { %s2133_s11 = sshra.s32 %s1354_s0, 4  ;;  %s2134_s11 = int_to_ptr.hbm [resolvable:$true] %s2133_s11 }
 0x33a   : > { %s2135_s9 = scalar_lea.hbm %s2134_s11, 128  ;;  %p2140_p13 = scmp.lt.s32.totalorder %s2134_s11, %s3176_s13 }
 0x33b   : > { %p2136_p8 = scmp.ne.s32.totalorder %s2134_s11, %s2135_s9  ;;  %p2141_p7 = scmp.lt.s32.totalorder %s2139_s16, %s2135_s9 }
 0x33d   : > { %p2137_p0 = pnand %p2136_p8, %p2527_p11  ;;  %p2142_p9 = por %p2141_p7, %p2140_p13 }
 0x33f   : > { %p2138_p3 = pneg %p2137_p0 }
 0x341   : > { %p2143_p10 = pnand %p2142_p9, %p2138_p3 }
 0x343   : > { %2146 = shalt.err (!%p2143_p10)
}
 0x344   : > { %s2288_s12 = smov 128   ;;  %s2289_s8 = smov 8  }
 0x345   : > { %1782 = dma.vmem_to_hbm [thread:$0]  (%p2527_p11), %s1352_s21, 2048, %s1354_s0, %s1339_s1, %s2288_s12, %s2288_s12, %s2289_s8  }
 0x346 PF: > { %p1810_p12 = scmp.ge.s32.totalorder %s2277_s6, 2  ;;  %s1368_s4 = sand.u32 1, %s2225_s18  }
 0x347   : > { %s1369_s14 = scalar_lea.sflag [#allocation5], %s1368_s4 }
 0x348   : > { %p1802_p6 = pnand %p1810_p12, %p2538_p5 }
 0x34a   : > { %p1803_p2 = pneg %p1802_p6 }
 0x34c   : > { %2220 = dma.done.wait (%p1803_p2), %s1369_s14, 2048  }
 0x34d   : > { %2222 = vsyncadd (%p1803_p2), %s1369_s14, 4294965248  ;;  %s25_s6 = sadd.s32 1, %s2277_s6   ;;  %s3178_s21 = sld [smem:[#allocation18_spill]] }
 0x34e   : > { %p3030_p4 = scmp.ge.s32.totalorder %s25_s6, 6   ;;  %s3179_s17 = sld [smem:[#allocation24_spill]] }
 0x34f   : > { %s3180_s15 = sld [smem:[#allocation25_spill]]  ;;  %s3184_s18 = smov %s2229_s19 }
 0x350   : > { %s3181_s29 = sld [smem:[#allocation21_spill]]  ;;  %s3185_s19 = smov %s2233_s20 }
 0x351   : > { %s3182_s0 = sld [smem:[#allocation22_spill]]  ;;  %s3186_s20 = smov %s2515_s27 }
 0x352   : > { %s3183_s1 = sld [smem:[#allocation23_spill]]  ;;  %s3187_s22 = smov %s2245_s23 }
 0x353   : > { %s3189_s24 = smov %s2253_s25  ;;  %s3190_s25 = smov %s2257_s26 }
 0x354   : > { %s3188_s23 = smov %s3179_s17  ;;  %s3193_s28 = smov %s2273_s30 }
 0x355   : > { %s3191_s26 = smov %s3180_s15  ;;  %24 = sbr.rel (!%p3030_p4) target bundleno = 19 (0x13), region = 125 }
 0x356   : > { %s3192_s27 = smov %s3181_s29 }
 0x357   : > { %s3194_s29 = smov %s3182_s0 }
 0x358   : > { %s3195_s30 = smov %s3183_s1 }
 0x35a   :  { %1375 = vsyncpa [#allocation4], 1 }
 0x35b   :  { %1377 = vsyncpa [#allocation4 + $0x1], 1 }
 0x35c   :  { %1378 = vsyncpa [#allocation7], 1 }
 0x35d   :  { %1380 = vsyncpa [#allocation7 + $0x1], 1 }
 0x35e   :  { %1381 = vsyncpa [#allocation10], 1 }
 0x35f   :  { %1382 = vsyncpa [#allocation5], 1 }
 0x360   :  { %1384 = vsyncpa [#allocation5 + $0x1], 1 }

</bundles_post_ra>
